<compile_context>
chip_gen: v7x
topology: tpu7x:2x2x1
jax: 0.10.0
libtpu: 0.0.40
codegen_flags: <defaults>
</compile_context>

<pallas_src>
import numpy as np
import jax
import jax.numpy as jnp
from jax.experimental import pallas as pl
from jax.experimental.pallas import tpu as pltpu

# ---- small, module-consistent shapes ----
H = W = 16                  # spatial (stand-in for the 28x28 intermediate features)
S = 8                       # num_segments
NEW_LENGTH = 1              # RGB modality
SAMPLE_LEN = 3 * NEW_LENGTH
NUM_CLASS = 10
FEAT_DIM = H * W            # feature_dim fed to new_fc (256)
CPAD = 128                  # lane-dense padded class dim
BN_EPS = 1e-5

B = 16                      # videos per call (batched to amortize launch / weight-DMA cost)
TILE_VIDEOS = 8             # videos per grid step -> (8, 128) sublane/lane-aligned logits tile
TILE_ROWS = TILE_VIDEOS * S  # 64 segment images per grid step
NUM_TILES = B // TILE_VIDEOS
assert B % TILE_VIDEOS == 0


# ----------------------------------------------------------------------------
# Fused kernel (one grid step = TILE_VIDEOS videos):
#   x tile -> [mean+conv1+bn1] matmul -> relu -> conv2 matmul -> relu
#          -> conv3 matmul -> +identity -> relu -> avg-consensus matmul -> new_fc matmul
# Stencil/FC weights have constant index_maps => VMEM-resident across the grid.
# ----------------------------------------------------------------------------
def tsn_fused_kernel(x_ref, m1_ref, m2_ref, m3_ref, shift_ref, avg_ref,
                     w_ref, b_ref, o_ref):
    # x_ref:  (TILE_ROWS, 3*HW) f32  -- row n = one segment image, lanes = c*HW + h*W + w
    # m1_ref: (3*HW, HW) bf16        -- channel-mean + conv1 stencil + bn1 scale, folded
    # m2_ref, m3_ref: (HW, HW) bf16  -- conv2/conv3 stencils with bn2/bn3 scale folded
    # shift_ref: SMEM f32[3]         -- folded BN shifts for the 3 convs
    # avg_ref: (TILE_VIDEOS, TILE_ROWS) bf16 -- segment-averaging (consensus) matrix
    # w_ref:  (HW, CPAD) bf16        -- new_fc weight^T, zero-padded classes
    # b_ref:  (1, CPAD) f32          -- new_fc bias, zero-padded
    # o_ref:  (TILE_VIDEOS, CPAD) f32
    hw = FEAT_DIM
    xv = x_ref[...]                                            # (64, 768) f32

    # Residual identity of the Bottleneck = channel mean of the input (cheap VPU path).
    x1 = (xv[:, 0:hw] + xv[:, hw:2 * hw] + xv[:, 2 * hw:3 * hw]) * (1.0 / 3.0)

    # conv1 + bn1 + relu (channel mean and BN scale folded into m1)
    h = jnp.dot(xv.astype(jnp.bfloat16), m1_ref[...],
                preferred_element_type=jnp.float32) + shift_ref[0]
    h = jnp.maximum(h, 0.0)
    # conv2 + bn2 + relu
    h = jnp.dot(h.astype(jnp.bfloat16), m2_ref[...],
                preferred_element_type=jnp.float32) + shift_ref[1]
    h = jnp.maximum(h, 0.0)
    # conv3 + bn3, residual, relu
    h = jnp.dot(h.astype(jnp.bfloat16), m3_ref[...],
                preferred_element_type=jnp.float32) + shift_ref[2]
    feats = jnp.maximum(h + x1, 0.0)                           # (64, 256) f32

    # avg consensus (constant averaging matrix) then new_fc; all lane-dense MXU work.
    mf = jnp.dot(avg_ref[...], feats.astype(jnp.bfloat16),
                 preferred_element_type=jnp.float32)           # (8, 256)
    o_ref[...] = (jnp.dot(mf.astype(jnp.bfloat16), w_ref[...],
                          preferred_element_type=jnp.float32)
                  + b_ref[...])


# ----------------------------------------------------------------------------
# TSN forward (RGB modality, consensus='avg', dropout>0, before_softmax=True)
# ----------------------------------------------------------------------------
def tsn_forward(x, params):
    # x: (B, S * SAMPLE_LEN, H, W) NCHW, as TSN.forward expects.
    # Free row-major reshape: input.view((-1, sample_len) + HW) then flatten chans+pixels.
    xr = x.reshape(B * S, SAMPLE_LEN * H * W)                  # (128, 768)
    out_pad = pl.pallas_call(
        tsn_fused_kernel,
        out_shape=jax.ShapeDtypeStruct((B, CPAD), jnp.float32),
        grid=(NUM_TILES,),
        in_specs=[
            # activation tile streams over the grid
            pl.BlockSpec((TILE_ROWS, SAMPLE_LEN * H * W), lambda t: (t, 0)),
            # weights: constant block index -> stay resident in VMEM across grid steps
            pl.BlockSpec((SAMPLE_LEN * H * W, FEAT_DIM), lambda t: (0, 0)),
            pl.BlockSpec((FEAT_DIM, FEAT_DIM), lambda t: (0, 0)),
            pl.BlockSpec((FEAT_DIM, FEAT_DIM), lambda t: (0, 0)),
            pl.BlockSpec(memory_space=pltpu.MemorySpace.SMEM),   # BN shifts
            pl.BlockSpec((TILE_VIDEOS, TILE_ROWS), lambda t: (0, 0)),
            pl.BlockSpec((FEAT_DIM, CPAD), lambda t: (0, 0)),
            pl.BlockSpec((1, CPAD), lambda t: (0, 0)),
        ],
        out_specs=pl.BlockSpec((TILE_VIDEOS, CPAD), lambda t: (t, 0)),
        compiler_params=pltpu.CompilerParams(
            dimension_semantics=("parallel",)),                  # megacore on v7x
    )(xr, params["m1"], params["m2"], params["m3"], params["shift"],
      params["avg"], params["fc_w_pad"], params["fc_b_pad"])
    # output.squeeze(1) -> (B, num_class); drop lane padding outside the kernel.
    return out_pad[:, :NUM_CLASS]


# ----------------------------------------------------------------------------
# Host-side weight preparation: conv -> stencil matrix, BN fold, bf16 cast.
# ----------------------------------------------------------------------------
def _stencil_matrix(w3x3):
    """(3,3) conv taps -> (HW, HW) matrix so that out_vec = in_vec @ M (zero 'same' padding)."""
    m = np.zeros((H * W, H * W), np.float32)
    for p in range(H * W):
        ph, pw = p // W, p % W
        for a in (-1, 0, 1):
            for b in (-1, 0, 1):
                qh, qw = ph + a, pw + b
                if 0 <= qh < H and 0 <= qw < W:
                    m[qh * W + qw, p] += w3x3[a + 1, b + 1]
    return m


def _bottleneck_weights(key):
    kw, kg, kb = jax.random.split(key, 3)
    conv_w = np.asarray(0.1 * jax.random.normal(kw, (3, 3, 3), jnp.float32))
    gamma = np.asarray(1.0 + 0.1 * jax.random.normal(kg, (3,), jnp.float32))
    beta = np.asarray(0.1 * jax.random.normal(kb, (3,), jnp.float32))
    run_mean = np.zeros((3,), np.float32)
    run_var = np.ones((3,), np.float32)
    scale = gamma / np.sqrt(run_var + BN_EPS)      # folded BN scale (into stencil matrices)
    shift = beta - run_mean * scale                # folded BN shift (added in-kernel)
    s1 = _stencil_matrix(conv_w[0]) * scale[0]
    m1 = np.concatenate([s1 * (1.0 / 3.0)] * 3, axis=0)   # fold RGB channel-mean: (768, 256)
    m2 = _stencil_matrix(conv_w[1]) * scale[1]
    m3 = _stencil_matrix(conv_w[2]) * scale[2]
    return (jnp.asarray(m1, jnp.bfloat16), jnp.asarray(m2, jnp.bfloat16),
            jnp.asarray(m3, jnp.bfloat16), jnp.asarray(shift, jnp.float32))


def init_params(key):
    k_r1, k_r2, k_fc = jax.random.split(key, 3)

    # res1 exists in TemResGen but its output is discarded by TemResGen.forward,
    # so it is never computed (kept only for structural parity).
    res1 = _bottleneck_weights(k_r1)
    m1, m2, m3, shift = _bottleneck_weights(k_r2)

    # _prepare_tsn: new_fc = Linear(feature_dim, num_class), weight ~ N(0, 0.001), bias = 0
    fc_w = 0.001 * jax.random.normal(k_fc, (NUM_CLASS, FEAT_DIM), jnp.float32)
    fc_b = jnp.zeros((NUM_CLASS,), jnp.float32)
    fc_w_pad = jnp.zeros((FEAT_DIM, CPAD), jnp.float32).at[:, :NUM_CLASS].set(fc_w.T)
    fc_b_pad = jnp.zeros((1, CPAD), jnp.float32).at[0, :NUM_CLASS].set(fc_b)

    # constant segment-averaging (avg consensus) matrix for one video tile
    avg = np.zeros((TILE_VIDEOS, TILE_ROWS), np.float32)
    for v in range(TILE_VIDEOS):
        avg[v, v * S:(v + 1) * S] = 1.0 / S

    return {
        "res1_unused": res1,
        "m1": m1, "m2": m2, "m3": m3, "shift": shift,
        "avg": jnp.asarray(avg, jnp.bfloat16),
        "fc_w_pad": fc_w_pad.astype(jnp.bfloat16),
        "fc_b_pad": fc_b_pad,
    }


if __name__ == "__main__":
    key = jax.random.PRNGKey(0)
    p_key, x_key = jax.random.split(key)
    params = init_params(p_key)
    x = jax.random.normal(x_key, (B, S * SAMPLE_LEN, H, W), jnp.float32)

    out = jax.jit(tsn_forward)(x, params)
    out = jax.block_until_ready(out)
    assert out.shape == (B, NUM_CLASS), out.shape
    assert bool(jnp.all(jnp.isfinite(out)))
    print("KERNEL_OK")
</pallas_src>

<mosaic_0001>
module attributes {stable_mosaic.version = 11 : i64} {
  func.func @tsn_fused_kernel(%arg0: i32, %arg1: memref<64x768xf32, #tpu.memory_space<vmem>>, %arg2: memref<768x256xbf16, #tpu.memory_space<vmem>>, %arg3: memref<256x256xbf16, #tpu.memory_space<vmem>>, %arg4: memref<256x256xbf16, #tpu.memory_space<vmem>>, %arg5: memref<3xf32, #tpu.memory_space<smem>>, %arg6: memref<8x64xbf16, #tpu.memory_space<vmem>>, %arg7: memref<256x128xbf16, #tpu.memory_space<vmem>>, %arg8: memref<1x128xf32, #tpu.memory_space<vmem>>, %arg9: memref<8x128xf32, #tpu.memory_space<vmem>>) attributes {dimension_semantics = [#tpu.dimension_semantics<parallel>], iteration_bounds = array<i64: 2>, scalar_prefetch = 0 : i64, scratch_operands = 0 : i64, tpu.core_type = #tpu.core_type<tc>, window_params = [{transform_indices = @transform_0, window_bounds = array<i64: 64, 768>}, {pipeline_mode = #tpu.pipeline_mode<synchronous>, transform_indices = @transform_1, window_bounds = array<i64: 768, 256>}, {pipeline_mode = #tpu.pipeline_mode<synchronous>, transform_indices = @transform_2, window_bounds = array<i64: 256, 256>}, {pipeline_mode = #tpu.pipeline_mode<synchronous>, transform_indices = @transform_3, window_bounds = array<i64: 256, 256>}, {transform_indices = @transform_4, window_bounds = array<i64: 3>}, {pipeline_mode = #tpu.pipeline_mode<synchronous>, transform_indices = @transform_5, window_bounds = array<i64: 8, 64>}, {pipeline_mode = #tpu.pipeline_mode<synchronous>, transform_indices = @transform_6, window_bounds = array<i64: 256, 128>}, {pipeline_mode = #tpu.pipeline_mode<synchronous>, transform_indices = @transform_7, window_bounds = array<i64: 1, 128>}, {transform_indices = @transform_8, window_bounds = array<i64: 8, 128>}]} {
    %c0 = arith.constant 0 : index
    %c0_0 = arith.constant 0 : index
    %0 = vector.load %arg1[%c0, %c0_0] : memref<64x768xf32, #tpu.memory_space<vmem>>, vector<64x768xf32>
    %1 = vector.extract_strided_slice %0 {offsets = [0, 0], sizes = [64, 256], strides = [1, 1]} : vector<64x768xf32> to vector<64x256xf32>
    %2 = vector.extract_strided_slice %0 {offsets = [0, 256], sizes = [64, 256], strides = [1, 1]} : vector<64x768xf32> to vector<64x256xf32>
    %3 = arith.addf %1, %2 : vector<64x256xf32>
    %4 = vector.extract_strided_slice %0 {offsets = [0, 512], sizes = [64, 256], strides = [1, 1]} : vector<64x768xf32> to vector<64x256xf32>
    %5 = arith.addf %3, %4 : vector<64x256xf32>
    %cst = arith.constant 0.333333343 : f32
    %6 = vector.broadcast %cst : f32 to vector<64x256xf32>
    %7 = arith.mulf %5, %6 : vector<64x256xf32>
    %8 = arith.truncf %0 : vector<64x768xf32> to vector<64x768xbf16>
    %c0_1 = arith.constant 0 : index
    %c0_2 = arith.constant 0 : index
    %9 = vector.load %arg2[%c0_1, %c0_2] : memref<768x256xbf16, #tpu.memory_space<vmem>>, vector<768x256xbf16>
    %cst_3 = arith.constant dense<0.000000e+00> : vector<64x256xf32>
    %10 = tpu.matmul %8, %9, %cst_3 {dimension_numbers = #tpu.dot_dimension_numbers<[1], [0], [0], [1], [0, 0, 1, 1], [], []>} : vector<64x768xbf16>, vector<768x256xbf16>, vector<64x256xf32> -> vector<64x256xf32>
    %c0_4 = arith.constant 0 : index
    %11 = memref.load %arg5[%c0_4] : memref<3xf32, #tpu.memory_space<smem>>
    %12 = vector.broadcast %11 : f32 to vector<64x256xf32>
    %13 = arith.addf %10, %12 : vector<64x256xf32>
    %cst_5 = arith.constant 0.000000e+00 : f32
    %14 = vector.broadcast %cst_5 : f32 to vector<64x256xf32>
    %15 = arith.maximumf %13, %14 : vector<64x256xf32>
    %16 = arith.truncf %15 : vector<64x256xf32> to vector<64x256xbf16>
    %c0_6 = arith.constant 0 : index
    %c0_7 = arith.constant 0 : index
    %17 = vector.load %arg3[%c0_6, %c0_7] : memref<256x256xbf16, #tpu.memory_space<vmem>>, vector<256x256xbf16>
    %cst_8 = arith.constant dense<0.000000e+00> : vector<64x256xf32>
    %18 = tpu.matmul %16, %17, %cst_8 {dimension_numbers = #tpu.dot_dimension_numbers<[1], [0], [0], [1], [0, 0, 1, 1], [], []>} : vector<64x256xbf16>, vector<256x256xbf16>, vector<64x256xf32> -> vector<64x256xf32>
    %c1 = arith.constant 1 : index
    %19 = memref.load %arg5[%c1] : memref<3xf32, #tpu.memory_space<smem>>
    %20 = vector.broadcast %19 : f32 to vector<64x256xf32>
    %21 = arith.addf %18, %20 : vector<64x256xf32>
    %cst_9 = arith.constant 0.000000e+00 : f32
    %22 = vector.broadcast %cst_9 : f32 to vector<64x256xf32>
    %23 = arith.maximumf %21, %22 : vector<64x256xf32>
    %24 = arith.truncf %23 : vector<64x256xf32> to vector<64x256xbf16>
    %c0_10 = arith.constant 0 : index
    %c0_11 = arith.constant 0 : index
    %25 = vector.load %arg4[%c0_10, %c0_11] : memref<256x256xbf16, #tpu.memory_space<vmem>>, vector<256x256xbf16>
    %cst_12 = arith.constant dense<0.000000e+00> : vector<64x256xf32>
    %26 = tpu.matmul %24, %25, %cst_12 {dimension_numbers = #tpu.dot_dimension_numbers<[1], [0], [0], [1], [0, 0, 1, 1], [], []>} : vector<64x256xbf16>, vector<256x256xbf16>, vector<64x256xf32> -> vector<64x256xf32>
    %c2 = arith.constant 2 : index
    %27 = memref.load %arg5[%c2] : memref<3xf32, #tpu.memory_space<smem>>
    %28 = vector.broadcast %27 : f32 to vector<64x256xf32>
    %29 = arith.addf %26, %28 : vector<64x256xf32>
    %30 = arith.addf %29, %7 : vector<64x256xf32>
    %cst_13 = arith.constant 0.000000e+00 : f32
    %31 = vector.broadcast %cst_13 : f32 to vector<64x256xf32>
    %32 = arith.maximumf %30, %31 : vector<64x256xf32>
    %c0_14 = arith.constant 0 : index
    %c0_15 = arith.constant 0 : index
    %33 = vector.load %arg6[%c0_14, %c0_15] : memref<8x64xbf16, #tpu.memory_space<vmem>>, vector<8x64xbf16>
    %34 = arith.truncf %32 : vector<64x256xf32> to vector<64x256xbf16>
    %cst_16 = arith.constant dense<0.000000e+00> : vector<8x256xf32>
    %35 = tpu.matmul %33, %34, %cst_16 {dimension_numbers = #tpu.dot_dimension_numbers<[1], [0], [0], [1], [0, 0, 1, 1], [], []>} : vector<8x64xbf16>, vector<64x256xbf16>, vector<8x256xf32> -> vector<8x256xf32>
    %36 = arith.truncf %35 : vector<8x256xf32> to vector<8x256xbf16>
    %c0_17 = arith.constant 0 : index
    %c0_18 = arith.constant 0 : index
    %37 = vector.load %arg7[%c0_17, %c0_18] : memref<256x128xbf16, #tpu.memory_space<vmem>>, vector<256x128xbf16>
    %cst_19 = arith.constant dense<0.000000e+00> : vector<8x128xf32>
    %38 = tpu.matmul %36, %37, %cst_19 {dimension_numbers = #tpu.dot_dimension_numbers<[1], [0], [0], [1], [0, 0, 1, 1], [], []>} : vector<8x256xbf16>, vector<256x128xbf16>, vector<8x128xf32> -> vector<8x128xf32>
    %c0_20 = arith.constant 0 : index
    %c0_21 = arith.constant 0 : index
    %39 = vector.load %arg8[%c0_20, %c0_21] : memref<1x128xf32, #tpu.memory_space<vmem>>, vector<1x128xf32>
    %40 = vector.broadcast %39 : vector<1x128xf32> to vector<8x128xf32>
    %41 = arith.addf %38, %40 : vector<8x128xf32>
    %c0_22 = arith.constant 0 : index
    %c0_23 = arith.constant 0 : index
    %42 = vector.load %arg9[%c0_22, %c0_23] : memref<8x128xf32, #tpu.memory_space<vmem>>, vector<8x128xf32>
    tpu.vector_store %arg9[%c0_22, %c0_23], %41 {strides = array<i32>} : memref<8x128xf32, #tpu.memory_space<vmem>>, vector<8x128xf32>,
    return
  }
  func.func @transform_0(%arg0: i32) -> (i32, i32) {
    %c0_i32 = arith.constant 0 : i32
    %c0_i32_0 = arith.constant 0 : i32
    return %arg0, %c0_i32 : i32, i32
  }
  func.func @transform_1(%arg0: i32) -> (i32, i32) {
    %c0_i32 = arith.constant 0 : i32
    %c0_i32_0 = arith.constant 0 : i32
    %c0_i32_1 = arith.constant 0 : i32
    return %c0_i32, %c0_i32_0 : i32, i32
  }
  func.func @transform_2(%arg0: i32) -> (i32, i32) {
    %c0_i32 = arith.constant 0 : i32
    %c0_i32_0 = arith.constant 0 : i32
    %c0_i32_1 = arith.constant 0 : i32
    return %c0_i32, %c0_i32_0 : i32, i32
  }
  func.func @transform_3(%arg0: i32) -> (i32, i32) {
    %c0_i32 = arith.constant 0 : i32
    %c0_i32_0 = arith.constant 0 : i32
    %c0_i32_1 = arith.constant 0 : i32
    return %c0_i32, %c0_i32_0 : i32, i32
  }
  func.func @transform_4(%arg0: i32) -> i32 {
    %c0_i32 = arith.constant 0 : i32
    %c0_i32_0 = arith.constant 0 : i32
    return %c0_i32 : i32
  }
  func.func @transform_5(%arg0: i32) -> (i32, i32) {
    %c0_i32 = arith.constant 0 : i32
    %c0_i32_0 = arith.constant 0 : i32
    %c0_i32_1 = arith.constant 0 : i32
    return %c0_i32, %c0_i32_0 : i32, i32
  }
  func.func @transform_6(%arg0: i32) -> (i32, i32) {
    %c0_i32 = arith.constant 0 : i32
    %c0_i32_0 = arith.constant 0 : i32
    %c0_i32_1 = arith.constant 0 : i32
    return %c0_i32, %c0_i32_0 : i32, i32
  }
  func.func @transform_7(%arg0: i32) -> (i32, i32) {
    %c0_i32 = arith.constant 0 : i32
    %c0_i32_0 = arith.constant 0 : i32
    %c0_i32_1 = arith.constant 0 : i32
    return %c0_i32, %c0_i32_0 : i32, i32
  }
  func.func @transform_8(%arg0: i32) -> (i32, i32) {
    %c0_i32 = arith.constant 0 : i32
    %c0_i32_0 = arith.constant 0 : i32
    return %arg0, %c0_i32 : i32, i32
  }
}

</mosaic_0001>

<bundles_post_ra>
// kernel: tsn_forward.1
= control target key start
LH: loop header
LB: loop body
LE: loop exit
PB: predicated region body
PF: predicated region fallthrough
CT: control target
= control target key end

     0   :  { %13 = vsyncpa [#allocation4], 0  ;;  %s3791_s0 = inlined_call_operand.vmem [shape: f32[128,768], index: 0, kind: input, shape index: {}]   ;;  %s3792_s1 = inlined_call_operand.vmem [shape: bf16[768,256], index: 1, kind: input, shape index: {}]   ;;  %s3793_s2 = inlined_call_operand.vmem [shape: bf16[256,256], index: 2, kind: input, shape index: {}]   ;;  %s3794_s3 = inlined_call_operand.vmem [shape: bf16[256,256], index: 3, kind: input, shape index: {}]   ;;  %s3795_s4 = inlined_call_operand.vmem [shape: f32[3], index: 4, kind: input, shape index: {}]   ;;  %s3796_s5 = inlined_call_operand.vmem [shape: bf16[8,64], index: 5, kind: input, shape index: {}]   ;;  %s3797_s6 = inlined_call_operand.vmem [shape: bf16[256,128], index: 6, kind: input, shape index: {}]   ;;  %s3798_s7 = inlined_call_operand.vmem [shape: f32[1,128], index: 7, kind: input, shape index: {}]   ;;  %s3799_s8 = inlined_call_operand.hbm [shape: f32[16,128], index: 8, kind: output, shape index: {}]  }
   0x1   :  { %14 = vsyncpa [#allocation3], 0 }
   0x2   :  { %16 = vsyncpa [#allocation3 + $0x1], 0  ;;  %s2874_s27 = smov 0   ;;  %s2876_s28 = smov 0  }
   0x3   :  { %s2878_s29 = smov 0   ;;  %s2880_s30 = smov 0  }
   0x4 LB: > { %s2895_s9 = sadd.s32 4294967295, %s2824_s30   ;;  %s2172_s10 = sadd.s32 4294967294, %s2824_s30   ;;  %s2824_s30 = sphi %s2880_s30, %s3806_s30   ;;  %s2820_s29 = sphi %s2878_s29, %s3805_s29   ;;  %s2816_s28 = sphi %s2876_s28, %s3804_s28   ;;  %s2812_s27 = sphi %s2874_s27, %s3803_s27  }
   0x5   : > { %s2899_s11 = sadd.s32 1, %s2824_s30   ;;  %s202_s12 = sadd.s32 1, %s2820_s29 }
   0x6   : > { %s199_s13 = ssub.s32 %s2824_s30, %s2899_s11  ;;  %p212_p0 = scmp.ne.s32.totalorder %s2820_s29, %s2816_s28 }
   0x7   : > { %p200_p1 = scmp.eq.s32.totalorder %s199_s13, 0  ;;  %p213_p2 = scmp.eq.s32.totalorder %s2895_s9, 1 }
   0x8   : > { %p218_p3 = scmp.ne.s32.totalorder %s2816_s28, %s2812_s27  ;;  %p219_p4 = scmp.eq.s32.totalorder %s2172_s10, 1 }
   0x9   : > { %s2910_s14 = scalar_select %p200_p1, %s2820_s29, %s202_s12  }
   0xa   : > { %p2912_p5 = por %p213_p2, %p212_p0  ;;  %p2916_p6 = por %p219_p4, %p218_p3 }
   0xb   : > { %p2173_p7 = scmp.ge.s32.totalorder %s2824_s30, 1  ;;  %p226_p8 = scmp.lt.s32.totalorder %s2824_s30, 3 }
   0xc   : > { %p2450_p9 = scmp.eq.s32.totalorder %s2895_s9, 0  ;;  %s248_s20 = sshll.u32 %s3795_s4, 4  ;;  %s249_s20 = int_to_ptr.vmem [resolvable:$true] %s248_s20 }
   0xd   : > { %p2923_p10 = pnand %p2173_p7, %p226_p8  ;;  %s2743_s21 = scalar_lea.vmem %s249_s20, 16 }
   0xe   : > { %p2744_p13 = scmp.ne.s32.totalorder %s249_s20, %s2743_s21  ;;  %p2751_p3 = scmp.lt.s32.totalorder %s249_s20, %s249_s20 }
   0xf   : > { %p2442_p11 = pneg %p2923_p10  ;;  %p2752_p4 = scmp.lt.s32.totalorder %s2743_s21, %s2743_s21 }
  0x11   : > { %p2443_p12 = pnand %p2450_p9, %p2442_p11  ;;  %p2753_p7 = por %p2752_p4, %p2751_p3 }
  0x13   : > { %p2745_p0 = pneg %p2443_p12 }
  0x15   : > { %p2746_p1 = pnand %p2745_p0, %p2744_p13 }
  0x17   : > { %p2747_p2 = pneg %p2746_p1 }
  0x19   : > { %p2754_p8 = pnand %p2753_p7, %p2747_p2 }
  0x1b   : > { %2757 = shalt.err (!%p2754_p8)
}
  0x1c   : > { %s2826_s22 = smov [#allocation2]   ;;  %280 = sbr.rel (%p2923_p10) target bundleno = 1373 (0x55d), region = 52 }
  0x1d   : > { %2445 = dma.vmem_to_smem (!%p2443_p12), %s249_s20, 16, %s2826_s22, [#allocation4]  }
  0x23   : > { %2803 = dma.done.wait (%p2450_p9), [#allocation4], 16  }
  0x24   : > { %2805 = vsyncadd (%p2450_p9), [#allocation4], 4294967280 }
  0x25   : > { %286 = sfence }
  0x26   : > { %v2487_v0 = vld [vmem:[%s3792_s1 + $0x4] ss:$8 sps:$4 sm:$0xff]   ;;  %v2489_v1 = vld [vmem:[%s3792_s1] ss:$8 sps:$4 sm:$0xff]   ;;  %v2490_v2 = vld [vmem:[%s3792_s1 + $0x14] ss:$8 sps:$4 sm:$0xff]  }
  0x27   : > { %1022 = vmatprep.subr.bf16.mxu0 %v2487_v0  ;;  %v2492_v3 = vld [vmem:[%s3792_s1 + $0x10] ss:$8 sps:$4 sm:$0xff]   ;;  %s2179_s18 = sshll.u32 %s2895_s9, 3  ;;  %v2493_v4 = vld [vmem:[%s3792_s1 + $0x24] ss:$8 sps:$4 sm:$0xff]   ;;  %s540_s19 = sld [smem:[#allocation2]] }
  0x28   : > { %1023 = vmatpush1.bf16.msra.mxu0 %v2489_v1  ;;  %p317_p9 = scmp.lt.s32.totalorder %s2179_s18, 15  ;;  %v2495_v5 = vld [vmem:[%s3792_s1 + $0x20] ss:$8 sps:$4 sm:$0xff]   ;;  %v2496_v6 = vld [vmem:[%s3792_s1 + $0x34] ss:$8 sps:$4 sm:$0xff]   ;;  %s2310_s17 = sld [smem:[#allocation2 + $0x2]] }
  0x29   : > { %1024 = vmatprep.subr.bf16.mxu0 %v2490_v2  ;;  %v2498_v7 = vld [vmem:[%s3792_s1 + $0x30] ss:$8 sps:$4 sm:$0xff]   ;;  %v2499_v8 = vld [vmem:[%s3792_s1 + $0x44] ss:$8 sps:$4 sm:$0xff]   ;;  %v2501_v9 = vld [vmem:[%s3792_s1 + $0x40] ss:$8 sps:$4 sm:$0xff]  }
  0x2a   : > { %s3808_s18 = smov (!%p317_p9, %s2179_s18), 15  ;;  %v2502_v10 = vld [vmem:[%s3792_s1 + $0x54] ss:$8 sps:$4 sm:$0xff]   ;;  %v2504_v11 = vld [vmem:[%s3792_s1 + $0x50] ss:$8 sps:$4 sm:$0xff]   ;;  %vm1864_vm0 = vcmask 523264  }
  0x2b   : > { %s2435_s13 = smul.u32 48, %s3808_s18  ;;  %v2505_v12 = vld [vmem:[%s3792_s1 + $0x64] ss:$8 sps:$4 sm:$0xff]   ;;  %v2507_v15 = vld [vmem:[%s3792_s1 + $0x60] ss:$8 sps:$4 sm:$0xff]   ;;  %s313_s26 = sand.u32 1, %s2816_s28  }
  0x2c   : > { %1025 = vmatpush1.bf16.msra.mxu0 %v2492_v3  ;;  %v2508_v22 = vld [vmem:[%s3792_s1 + $0x74] ss:$8 sps:$4 sm:$0xff]   ;;  %v2510_v32 = vld [vmem:[%s3792_s1 + $0x70] ss:$8 sps:$4 sm:$0xff]   ;;  %v2511_v33 = vld [vmem:[%s3792_s1 + $0x84] ss:$8 sps:$4 sm:$0xff]  }
  0x2d   : > { %1026 = vmatprep.subr.bf16.mxu0 %v2493_v4  ;;  %s2977_s24 = scalar_lea.vmem %s3791_s0, %s2435_s13  ;;  %v2513_v34 = vld [vmem:[%s3792_s1 + $0x80] ss:$8 sps:$4 sm:$0xff]   ;;  %v2514_v35 = vld [vmem:[%s3792_s1 + $0x94] ss:$8 sps:$4 sm:$0xff]   ;;  %v2516_v36 = vld [vmem:[%s3792_s1 + $0x90] ss:$8 sps:$4 sm:$0xff]  }
  0x2e   : > { %v325_v13 = vld [vmem:[%s2977_s24 + $0x8] sm:$0xff]  ;;  %v2987_v14 = vld [vmem:[%s2977_s24 + $0x18] sm:$0xff]  ;;  %v3011_v25 = vld [vmem:[%s2977_s24] sm:$0xff]  ;;  %s2277_s13 = sld [smem:[#allocation2 + $0x1]]  ;;  %s2178_s10 = sshll.u32 %s313_s26, 3 }
  0x2f   : > { %v331_v16 = vld [vmem:[%s2977_s24 + $0x38] sm:$0xff]  ;;  %v2994_v17 = vld [vmem:[%s2977_s24 + $0x48] sm:$0xff]  ;;  %v373_v18 = vadd.f32 %v2987_v14, %v325_v13  ;;  %v3017_v27 = vld [vmem:[%s2977_s24 + $0x10] sm:$0xff]  ;;  %s2088_s18 = scalar_lea.sflag [#allocation3], %s313_s26 }
  0x30   : > { %1027 = vmatpush1.bf16.msra.mxu0 %v2495_v5  ;;  %v2998_v19 = vld [vmem:[%s2977_s24 + $0x28] sm:$0xff]  ;;  %v375_v20 = vadd.f32 %v2994_v17, %v331_v16  ;;  %v421_v21 = vpack.c.bf16 %v331_v16, %v325_v13  ;;  %v3005_v23 = vld [vmem:[%s2977_s24 + $0x58] sm:$0xff]  ;;  %v330_v28 = vld [vmem:[%s2977_s24 + $0x30] sm:$0xff]  ;;  %v3025_v30 = vadd.f32 %v3017_v27, %v3011_v25 }
  0x31   : > { %1028 = vmatprep.subr.bf16.mxu0 %v2496_v6  ;;  %v3008_v24 = vadd.f32 %v373_v18, %v2998_v19  ;;  %v3021_v29 = vld [vmem:[%s2977_s24 + $0x40] sm:$0xff]  ;;  %v2520_v39 = vld [vmem:[%s3792_s1 + $0xb4] ss:$8 sps:$4 sm:$0xff]   ;;  %v2522_v40 = vld [vmem:[%s3792_s1 + $0xb0] ss:$8 sps:$4 sm:$0xff]   ;;  %v420_v53 = vpack.c.bf16 %v330_v28, %v3011_v25 }
  0x32   : > { %v3014_v26 = vadd.f32 %v375_v20, %v3005_v23  ;;  %1054 = vmatprep.mubr.bf16.mxu0 %v421_v21  ;;  %v3028_v31 = vadd.f32 %v3021_v29, %v330_v28  ;;  %v2517_v37 = vld [vmem:[%s3792_s1 + $0xa4] ss:$8 sps:$4 sm:$0xff]   ;;  %v2519_v38 = vld [vmem:[%s3792_s1 + $0xa0] ss:$8 sps:$4 sm:$0xff]   ;;  %v2526_v43 = vld [vmem:[%s3792_s1 + $0xd4] ss:$8 sps:$4 sm:$0xff]  }
  0x33   : > { %v2523_v41 = vld [vmem:[%s3792_s1 + $0xc4] ss:$8 sps:$4 sm:$0xff]   ;;  %v2525_v42 = vld [vmem:[%s3792_s1 + $0xc0] ss:$8 sps:$4 sm:$0xff]   ;;  %v2528_v44 = vld [vmem:[%s3792_s1 + $0xd0] ss:$8 sps:$4 sm:$0xff]  }
  0x34   : > { %1029 = vmatpush1.bf16.msra.mxu0 %v2498_v7  ;;  %v2529_v45 = vld [vmem:[%s3792_s1 + $0xe4] ss:$8 sps:$4 sm:$0xff]   ;;  %v2531_v46 = vld [vmem:[%s3792_s1 + $0xe0] ss:$8 sps:$4 sm:$0xff]   ;;  %v2532_v47 = vld [vmem:[%s3792_s1 + $0xf4] ss:$8 sps:$4 sm:$0xff]  }
  0x35   : > { %1030 = vmatprep.subr.bf16.mxu0 %v2499_v8  ;;  %v2534_v48 = vld [vmem:[%s3792_s1 + $0xf0] ss:$8 sps:$4 sm:$0xff]   ;;  %v2537_v49 = vld [vmem:[%s3792_s1 + $0x104] ss:$8 sps:$4 sm:$0xff]   ;;  %v2535_v52 = vld [vmem:[%s3792_s1 + $0x100] ss:$8 sps:$4 sm:$0xff]  }
  0x36   : > { %v337_v50 = vld [vmem:[%s2977_s24 + $0x68] sm:$0xff]  ;;  %v343_v51 = vld [vmem:[%s2977_s24 + $0x98] sm:$0xff]  ;;  %v336_v55 = vld [vmem:[%s2977_s24 + $0x60] sm:$0xff] }
  0x37   : > { %v2540_v54 = vld [vmem:[%s3792_s1 + $0x114] ss:$8 sps:$4 sm:$0xff]   ;;  %v427_v56 = vpack.c.bf16 %v343_v51, %v337_v50  ;;  %v3099_v59 = vld [vmem:[%s2977_s24 + $0xa8] sm:$0xff]  ;;  %v3111_v63 = vld [vmem:[%s2977_s24 + $0xa0] sm:$0xff] }
  0x38   : > { %1031 = vmatpush1.bf16.msra.mxu0 %v2501_v9  ;;  %v342_v57 = vld [vmem:[%s2977_s24 + $0x90] sm:$0xff]  ;;  %v3096_v58 = vld [vmem:[%s2977_s24 + $0x78] sm:$0xff]  ;;  %v3105_v61 = vadd.f32 %v3099_v59, %v343_v51  ;;  %v349_v1 = vld [vmem:[%s2977_s24 + $0xc8] sm:$0xff] }
  0x39   : > { %1032 = vmatprep.subr.bf16.mxu0 %v2502_v10  ;;  %v3102_v60 = vadd.f32 %v3096_v58, %v337_v50  ;;  %v3108_v62 = vld [vmem:[%s2977_s24 + $0x70] sm:$0xff]  ;;  %v355_v2 = vld [vmem:[%s2977_s24 + $0xf8] sm:$0xff]  ;;  %v3122_v4 = vadd.f32 %v3111_v63, %v342_v57  ;;  %v2543_v5 = vld [vmem:[%s3792_s1 + $0x124] ss:$8 sps:$4 sm:$0xff]   ;;  %v426_v25 = vpack.c.bf16 %v342_v57, %v336_v55 }
  0x3a   : > { %v2538_v0 = vld [vmem:[%s3792_s1 + $0x110] ss:$8 sps:$4 sm:$0xff]   ;;  %v3119_v3 = vadd.f32 %v3108_v62, %v336_v55  ;;  %v348_v6 = vld [vmem:[%s2977_s24 + $0xc0] sm:$0xff]  ;;  %v3133_v9 = vld [vmem:[%s2977_s24 + $0x108] sm:$0xff] }
  0x3b   : > { %v354_v7 = vld [vmem:[%s2977_s24 + $0xf0] sm:$0xff]  ;;  %v3130_v8 = vld [vmem:[%s2977_s24 + $0xd8] sm:$0xff]  ;;  %v3145_v13 = vld [vmem:[%s2977_s24 + $0x100] sm:$0xff] }
  0x3c   : > { %1033 = vmatpush1.bf16.msra.mxu0 %v2504_v11  ;;  %v3136_v10 = vadd.f32 %v3130_v8, %v349_v1  ;;  %v3139_v11 = vadd.f32 %v3133_v9, %v355_v2  ;;  %v361_v16 = vld [vmem:[%s2977_s24 + $0x128] sm:$0xff]  ;;  %v367_v18 = vld [vmem:[%s2977_s24 + $0x158] sm:$0xff]  ;;  %v3156_v21 = vadd.f32 %v3145_v13, %v354_v7  ;;  %v360_v28 = vld [vmem:[%s2977_s24 + $0x120] sm:$0xff] }
  0x3d   : > { %1034 = vmatprep.subr.bf16.mxu0 %v2505_v12  ;;  %v3142_v12 = vld [vmem:[%s2977_s24 + $0xd0] sm:$0xff]  ;;  %v2553_v50 = vld [vmem:[%s3792_s1 + $0x160] ss:$8 sps:$4 sm:$0xff]  }
  0x3e   : > { %v3153_v20 = vadd.f32 %v3142_v12, %v348_v6  ;;  %v2558_v51 = vld [vmem:[%s3792_s1 + $0x174] ss:$8 sps:$4 sm:$0xff]   ;;  %v2633_v55 = vld [vmem:[%s3793_s2] ss:$8 sps:$4 sm:$0xff]   ;;  %v2556_v57 = vld [vmem:[%s3792_s1 + $0x170] ss:$8 sps:$4 sm:$0xff]  }
  0x40   : > { %1035 = vmatpush1.bf16.msra.mxu0 %v2507_v15  ;;  %v2541_v15 = vld [vmem:[%s3792_s1 + $0x120] ss:$8 sps:$4 sm:$0xff]  }
  0x41   : > { %1036 = vmatprep.subr.bf16.mxu0 %v2508_v22  ;;  %v2546_v22 = vld [vmem:[%s3792_s1 + $0x134] ss:$8 sps:$4 sm:$0xff]  }
  0x44   : > { %1037 = vmatpush1.bf16.msra.mxu0 %v2510_v32  ;;  %v433_v32 = vpack.c.bf16 %v355_v2, %v349_v1  ;;  %v2559_v1 = vld [vmem:[%s3792_s1 + $0x180] ss:$8 sps:$4 sm:$0xff]   ;;  %v2564_v2 = vld [vmem:[%s3792_s1 + $0x194] ss:$8 sps:$4 sm:$0xff]  }
  0x45   : > { %1038 = vmatprep.subr.bf16.mxu0 %v2511_v33  ;;  %v366_v33 = vld [vmem:[%s2977_s24 + $0x150] sm:$0xff] }
  0x48   : > { %1039 = vmatpush1.bf16.msra.mxu0 %v2513_v34  ;;  %v3164_v34 = vld [vmem:[%s2977_s24 + $0x138] sm:$0xff] }
  0x49   : > { %1040 = vmatprep.subr.bf16.mxu0 %v2514_v35  ;;  %v3167_v35 = vld [vmem:[%s2977_s24 + $0x168] sm:$0xff] }
  0x4c   : > { %1041 = vmatpush1.bf16.msra.mxu0 %v2516_v36  ;;  %v3170_v36 = vadd.f32 %v3164_v34, %v361_v16 }
  0x4d   : > { %1042 = vmatprep.subr.bf16.mxu0 %v2517_v37  ;;  %v3173_v37 = vadd.f32 %v3167_v35, %v367_v18 }
  0x50   : > { %1043 = vmatpush1.bf16.msra.mxu0 %v2519_v38  ;;  %v3176_v38 = vld [vmem:[%s2977_s24 + $0x130] sm:$0xff] }
  0x51   : > { %1044 = vmatprep.subr.bf16.mxu0 %v2520_v39  ;;  %v3179_v39 = vld [vmem:[%s2977_s24 + $0x160] sm:$0xff] }
  0x54   : > { %1045 = vmatpush1.bf16.msra.mxu0 %v2522_v40  ;;  %v3182_v40 = vadd.f32 %v3176_v38, %v360_v28 }
  0x55   : > { %1046 = vmatprep.subr.bf16.mxu0 %v2523_v41  ;;  %v3185_v41 = vadd.f32 %v3179_v39, %v366_v33 }
  0x58   : > { %1047 = vmatpush1.bf16.msra.mxu0 %v2525_v42  ;;  %v2544_v42 = vld [vmem:[%s3792_s1 + $0x130] ss:$8 sps:$4 sm:$0xff]  }
  0x59   : > { %1048 = vmatprep.subr.bf16.mxu0 %v2526_v43  ;;  %v2549_v43 = vld [vmem:[%s3792_s1 + $0x144] ss:$8 sps:$4 sm:$0xff]  }
  0x5c   : > { %1049 = vmatpush1.bf16.msra.mxu0 %v2528_v44  ;;  %v2547_v44 = vld [vmem:[%s3792_s1 + $0x140] ss:$8 sps:$4 sm:$0xff]  }
  0x5d   : > { %1050 = vmatprep.subr.bf16.mxu0 %v2529_v45  ;;  %v2552_v45 = vld [vmem:[%s3792_s1 + $0x154] ss:$8 sps:$4 sm:$0xff]  }
  0x60   : > { %1051 = vmatpush1.bf16.msra.mxu0 %v2531_v46  ;;  %v432_v46 = vpack.c.bf16 %v354_v7, %v348_v6  ;;  %v2562_v6 = vld [vmem:[%s3792_s1 + $0x190] ss:$8 sps:$4 sm:$0xff]   ;;  %v2567_v7 = vld [vmem:[%s3792_s1 + $0x1a4] ss:$8 sps:$4 sm:$0xff]  }
  0x61   : > { %1052 = vmatprep.subr.bf16.mxu0 %v2532_v47  ;;  %v439_v47 = vpack.c.bf16 %v367_v18, %v361_v16  ;;  %v2642_v16 = vld [vmem:[%s3793_s2 + $0x30] ss:$8 sps:$4 sm:$0xff]   ;;  %v2643_v18 = vld [vmem:[%s3793_s2 + $0x44] ss:$8 sps:$4 sm:$0xff]  }
  0x64   : > { %1053 = vmatpush1.bf16.msra.mxu0 %v2534_v48  ;;  %v2550_v48 = vld [vmem:[%s3792_s1 + $0x150] ss:$8 sps:$4 sm:$0xff]  }
  0x65   : > { %1095 = vmatprep.subr.bf16.mxu0 %v2537_v49  ;;  %v2555_v49 = vld [vmem:[%s3792_s1 + $0x164] ss:$8 sps:$4 sm:$0xff]  }
  0x67   : > { %1055 = vmatmul.mubr.bf16.vlgmr.msra.gmra.mrb[0].mxu0 %v420_v53  ;;  %v423_v53 = vpack.c.bf16 %v2994_v17, %v2987_v14  ;;  %v2561_v14 = vld [vmem:[%s3792_s1 + $0x184] ss:$8 sps:$4 sm:$0xff]   ;;  %v2636_v17 = vld [vmem:[%s3793_s2 + $0x10] ss:$8 sps:$4 sm:$0xff]  }
  0x68   : > { %1096 = vmatpush1.bf16.msra.mxu0 %v2535_v52  ;;  %1064 = vmatprep.mubr.bf16.mxu0 %v427_v56  ;;  %v438_v52 = vpack.c.bf16 %v366_v33, %v360_v28  ;;  %v2634_v56 = vld [vmem:[%s3793_s2 + $0x14] ss:$8 sps:$4 sm:$0xff]   ;;  %v2645_v28 = vld [vmem:[%s3793_s2 + $0x40] ss:$8 sps:$4 sm:$0xff]   ;;  %v2568_v33 = vld [vmem:[%s3792_s1 + $0x1b0] ss:$8 sps:$4 sm:$0xff]  }
  0x69   : > { %1097 = vmatprep.subr.bf16.mxu0 %v2540_v54  ;;  %v2631_v54 = vld [vmem:[%s3793_s2 + $0x4] ss:$8 sps:$4 sm:$0xff]  }
  0x6a   : > { %1459 = vmatprep.subr.bf16.mxu1 %v2631_v54  ;;  %v2582_v54 = vld [vmem:[%s3792_s1 + $0x1f4] ss:$8 sps:$4 sm:$0xff]  }
  0x6b   : > { %1460 = vmatpush1.bf16.msra.mxu1 %v2633_v55  ;;  %v2657_v55 = vld [vmem:[%s3793_s2 + $0x80] ss:$8 sps:$4 sm:$0xff]  }
  0x6c   : > { %1098 = vmatpush1.bf16.msra.mxu0 %v2538_v0  ;;  %1461 = vmatprep.subr.bf16.mxu1 %v2634_v56  ;;  %v2637_v0 = vld [vmem:[%s3793_s2 + $0x24] ss:$8 sps:$4 sm:$0xff]   ;;  %v2658_v56 = vld [vmem:[%s3793_s2 + $0x94] ss:$8 sps:$4 sm:$0xff]  }
  0x6d   : > { %1099 = vmatprep.subr.bf16.mxu0 %v2543_v5  ;;  %v2639_v5 = vld [vmem:[%s3793_s2 + $0x20] ss:$8 sps:$4 sm:$0xff]  }
  0x6f   : > { %1065 = vmatmul.mubr.bf16.gmra.mrb[4].mxu0 %v426_v25  ;;  %1462 = vmatpush1.bf16.msra.mxu1 %v2636_v17  ;;  %v2570_v25 = vld [vmem:[%s3792_s1 + $0x1b4] ss:$8 sps:$4 sm:$0xff]   ;;  %v2660_v17 = vld [vmem:[%s3793_s2 + $0x90] ss:$8 sps:$4 sm:$0xff]  }
  0x70   : > { %1100 = vmatpush1.bf16.msra.mxu0 %v2541_v15  ;;  %1074 = vmatprep.mubr.bf16.mxu0 %v433_v32  ;;  %v2640_v15 = vld [vmem:[%s3793_s2 + $0x34] ss:$8 sps:$4 sm:$0xff]  }
  0x71   : > { %1101 = vmatprep.subr.bf16.mxu0 %v2546_v22  ;;  %1463 = vmatprep.subr.bf16.mxu1 %v2637_v0  ;;  %v2565_v22 = vld [vmem:[%s3792_s1 + $0x1a0] ss:$8 sps:$4 sm:$0xff]   ;;  %v2646_v32 = vld [vmem:[%s3793_s2 + $0x54] ss:$8 sps:$4 sm:$0xff]   ;;  %v422_v0 = vpack.c.bf16 %v3021_v29, %v3017_v27 }
  0x72   : > { %v2663_v27 = vld [vmem:[%s3793_s2 + $0xa0] ss:$8 sps:$4 sm:$0xff]   ;;  %v2664_v29 = vld [vmem:[%s3793_s2 + $0xb4] ss:$8 sps:$4 sm:$0xff]  }
  0x73   : > { %1464 = vmatpush1.bf16.msra.mxu1 %v2639_v5  ;;  %v429_v5 = vpack.c.bf16 %v3099_v59, %v3096_v58  ;;  %v2586_v58 = vld [vmem:[%s3792_s1 + $0x210] ss:$8 sps:$4 sm:$0xff]   ;;  %v2591_v59 = vld [vmem:[%s3792_s1 + $0x224] ss:$8 sps:$4 sm:$0xff]  }
  0x74   : > { %1102 = vmatpush1.bf16.msra.mxu0 %v2544_v42  ;;  %1465 = vmatprep.subr.bf16.mxu1 %v2640_v15  ;;  %v2573_v42 = vld [vmem:[%s3792_s1 + $0x1c4] ss:$8 sps:$4 sm:$0xff]   ;;  %v428_v15 = vpack.c.bf16 %v3111_v63, %v3108_v62  ;;  %v2669_v62 = vld [vmem:[%s3793_s2 + $0xc0] ss:$8 sps:$4 sm:$0xff]   ;;  %v2670_v63 = vld [vmem:[%s3793_s2 + $0xd4] ss:$8 sps:$4 sm:$0xff]  }
  0x75   : > { %1103 = vmatprep.subr.bf16.mxu0 %v2549_v43  ;;  %v2648_v43 = vld [vmem:[%s3793_s2 + $0x50] ss:$8 sps:$4 sm:$0xff]  }
  0x77   : > { %1075 = vmatmul.mubr.bf16.gmra.mrb[8].mxu0 %v432_v46  ;;  %1466 = vmatpush1.bf16.msra.mxu1 %v2642_v16  ;;  %v2576_v46 = vld [vmem:[%s3792_s1 + $0x1d4] ss:$8 sps:$4 sm:$0xff]   ;;  %v2667_v16 = vld [vmem:[%s3793_s2 + $0xc4] ss:$8 sps:$4 sm:$0xff]  }
  0x78   : > { %1104 = vmatpush1.bf16.msra.mxu0 %v2547_v44  ;;  %1084 = vmatprep.mubr.bf16.mxu0 %v439_v47  ;;  %v2649_v44 = vld [vmem:[%s3793_s2 + $0x64] ss:$8 sps:$4 sm:$0xff]   ;;  %v2651_v47 = vld [vmem:[%s3793_s2 + $0x60] ss:$8 sps:$4 sm:$0xff]  }
  0x79   : > { %1105 = vmatprep.subr.bf16.mxu0 %v2552_v45  ;;  %1467 = vmatprep.subr.bf16.mxu1 %v2643_v18  ;;  %v2571_v45 = vld [vmem:[%s3792_s1 + $0x1c0] ss:$8 sps:$4 sm:$0xff]  }
  0x7a   : > { %v2589_v18 = vld [vmem:[%s3792_s1 + $0x220] ss:$8 sps:$4 sm:$0xff]  }
  0x7b   : > { %1468 = vmatpush1.bf16.msra.mxu1 %v2645_v28  ;;  %v434_v28 = vpack.c.bf16 %v3145_v13, %v3142_v12  ;;  %v2598_v12 = vld [vmem:[%s3792_s1 + $0x250] ss:$8 sps:$4 sm:$0xff]   ;;  %v2603_v13 = vld [vmem:[%s3792_s1 + $0x264] ss:$8 sps:$4 sm:$0xff]  }
  0x7c   : > { %1106 = vmatpush1.bf16.msra.mxu0 %v2550_v48  ;;  %1469 = vmatprep.subr.bf16.mxu1 %v2646_v32  ;;  %v2652_v48 = vld [vmem:[%s3793_s2 + $0x74] ss:$8 sps:$4 sm:$0xff]   ;;  %v2595_v32 = vld [vmem:[%s3792_s1 + $0x240] ss:$8 sps:$4 sm:$0xff]  }
  0x7d   : > { %1107 = vmatprep.subr.bf16.mxu0 %v2555_v49  ;;  %v2574_v49 = vld [vmem:[%s3792_s1 + $0x1d0] ss:$8 sps:$4 sm:$0xff]  }
  0x7f   : > { %1085 = vmatmul.mubr.bf16.gmra.mrb[12].mxu0 %v438_v52  ;;  %1470 = vmatpush1.bf16.msra.mxu1 %v2648_v43  ;;  %v2655_v52 = vld [vmem:[%s3793_s2 + $0x84] ss:$8 sps:$4 sm:$0xff]   ;;  %v425_v43 = vpack.c.bf16 %v3005_v23, %v2998_v19  ;;  %v2607_v19 = vld [vmem:[%s3792_s1 + $0x280] ss:$8 sps:$4 sm:$0xff]   ;;  %v2612_v23 = vld [vmem:[%s3792_s1 + $0x294] ss:$8 sps:$4 sm:$0xff]  }
  0x80   : > { %1108 = vmatpush1.bf16.msra.mxu0 %v2553_v50  ;;  %1127 = vmatprep.mubr.bf16.mxu0 %v423_v53  ;;  %v2579_v50 = vld [vmem:[%s3792_s1 + $0x1e4] ss:$8 sps:$4 sm:$0xff]   ;;  %v2577_v53 = vld [vmem:[%s3792_s1 + $0x1e0] ss:$8 sps:$4 sm:$0xff]  }
  0x81   : > { %1109 = vmatprep.subr.bf16.mxu0 %v2558_v51  ;;  %1471 = vmatprep.subr.bf16.mxu1 %v2649_v44  ;;  %v2654_v51 = vld [vmem:[%s3793_s2 + $0x70] ss:$8 sps:$4 sm:$0xff]   ;;  %v2606_v44 = vld [vmem:[%s3792_s1 + $0x274] ss:$8 sps:$4 sm:$0xff]  }
  0x83   : > { %1472 = vmatpush1.bf16.msra.mxu1 %v2651_v47  ;;  %v2613_v47 = vld [vmem:[%s3792_s1 + $0x2a0] ss:$8 sps:$4 sm:$0xff]  }
  0x84   : > { %1110 = vmatpush1.bf16.msra.mxu0 %v2556_v57  ;;  %1473 = vmatprep.subr.bf16.mxu1 %v2652_v48  ;;  %v2580_v57 = vld [vmem:[%s3792_s1 + $0x1f0] ss:$8 sps:$4 sm:$0xff]   ;;  %v2618_v48 = vld [vmem:[%s3792_s1 + $0x2b4] ss:$8 sps:$4 sm:$0xff]  }
  0x85   : > { %1111 = vmatprep.subr.bf16.mxu0 %v2561_v14  ;;  %v2585_v14 = vld [vmem:[%s3792_s1 + $0x204] ss:$8 sps:$4 sm:$0xff]  }
  0x87   : > { %1474 = vmatpush1.bf16.msra.mxu1 %v2654_v51  ;;  %v2619_v51 = vld [vmem:[%s3792_s1 + $0x2c0] ss:$8 sps:$4 sm:$0xff]  }
  0x88   : > { %1112 = vmatpush1.bf16.msra.mxu0 %v2559_v1  ;;  %1475 = vmatprep.subr.bf16.mxu1 %v2655_v52  ;;  %v2661_v1 = vld [vmem:[%s3793_s2 + $0xa4] ss:$8 sps:$4 sm:$0xff]   ;;  %v2624_v52 = vld [vmem:[%s3792_s1 + $0x2d4] ss:$8 sps:$4 sm:$0xff]  }
  0x89   : > { %1113 = vmatprep.subr.bf16.mxu0 %v2564_v2  ;;  %v2583_v2 = vld [vmem:[%s3792_s1 + $0x200] ss:$8 sps:$4 sm:$0xff]  }
  0x8b   : > { %1476 = vmatpush1.bf16.msra.mxu1 %v2657_v55  ;;  %v2625_v55 = vld [vmem:[%s3792_s1 + $0x2e0] ss:$8 sps:$4 sm:$0xff]  }
  0x8c   : > { %1114 = vmatpush1.bf16.msra.mxu0 %v2562_v6  ;;  %1477 = vmatprep.subr.bf16.mxu1 %v2658_v56  ;;  %v2588_v6 = vld [vmem:[%s3792_s1 + $0x214] ss:$8 sps:$4 sm:$0xff]  }
  0x8d   : > { %1115 = vmatprep.subr.bf16.mxu0 %v2567_v7  ;;  %v2666_v7 = vld [vmem:[%s3793_s2 + $0xb0] ss:$8 sps:$4 sm:$0xff]   ;;  %v2630_v56 = vld [vmem:[%s3792_s1 + $0x2f4] ss:$8 sps:$4 sm:$0xff]  }
  0x8f   : > { %1478 = vmatpush1.bf16.msra.mxu1 %v2660_v17  ;;  %v3461_v17 = vld [vmem:[%s2977_s24 + $0x50] sm:$0xff] }
  0x90   : > { %1116 = vmatpush1.bf16.msra.mxu0 %v2565_v22  ;;  %1479 = vmatprep.subr.bf16.mxu1 %v2661_v1  ;;  %v435_v22 = vpack.c.bf16 %v3133_v9, %v3130_v8  ;;  %v2592_v8 = vld [vmem:[%s3792_s1 + $0x230] ss:$8 sps:$4 sm:$0xff]   ;;  %v2597_v9 = vld [vmem:[%s3792_s1 + $0x244] ss:$8 sps:$4 sm:$0xff]  }
  0x91   : > { %1117 = vmatprep.subr.bf16.mxu0 %v2570_v25  ;;  %v2594_v25 = vld [vmem:[%s3792_s1 + $0x234] ss:$8 sps:$4 sm:$0xff]  }
  0x92   : > { %v3467_v1 = vld [vmem:[%s2977_s24 + $0xb8] sm:$0xff] }
  0x93   : > { %1480 = vmatpush1.bf16.msra.mxu1 %v2663_v27  ;;  %v3477_v27 = vld [vmem:[%s2977_s24 + $0xb0] sm:$0xff] }
  0x94   : > { %1118 = vmatpush1.bf16.msra.mxu0 %v2568_v33  ;;  %1481 = vmatprep.subr.bf16.mxu1 %v2664_v29  ;;  %v441_v33 = vpack.c.bf16 %v3167_v35, %v3164_v34  ;;  %v440_v34 = vpack.c.bf16 %v3179_v39, %v3176_v38  ;;  %v2601_v35 = vld [vmem:[%s3792_s1 + $0x260] ss:$8 sps:$4 sm:$0xff]   ;;  %v2609_v38 = vld [vmem:[%s3792_s1 + $0x284] ss:$8 sps:$4 sm:$0xff]   ;;  %v2610_v39 = vld [vmem:[%s3792_s1 + $0x290] ss:$8 sps:$4 sm:$0xff]  }
  0x95   : > { %1119 = vmatprep.subr.bf16.mxu0 %v2573_v42  ;;  %v2600_v42 = vld [vmem:[%s3792_s1 + $0x254] ss:$8 sps:$4 sm:$0xff]   ;;  %v3480_v29 = vld [vmem:[%s2977_s24 + $0xe8] sm:$0xff] }
  0x97   : > { %1482 = vmatpush1.bf16.msra.mxu1 %v2666_v7 }
  0x98   : > { %1120 = vmatpush1.bf16.msra.mxu0 %v2571_v45  ;;  %1483 = vmatprep.subr.bf16.mxu1 %v2667_v16  ;;  %v2604_v45 = vld [vmem:[%s3792_s1 + $0x270] ss:$8 sps:$4 sm:$0xff]  }
  0x99   : > { %1121 = vmatprep.subr.bf16.mxu0 %v2576_v46  ;;  %v2615_v46 = vld [vmem:[%s3792_s1 + $0x2a4] ss:$8 sps:$4 sm:$0xff]   ;;  %v3493_v16 = vld [vmem:[%s2977_s24 + $0x110] sm:$0xff] }
  0x9b   : > { %1484 = vmatpush1.bf16.msra.mxu1 %v2669_v62 }
  0x9c   : > { %1122 = vmatpush1.bf16.msra.mxu0 %v2574_v49  ;;  %1485 = vmatprep.subr.bf16.mxu1 %v2670_v63  ;;  %v2616_v49 = vld [vmem:[%s3792_s1 + $0x2b0] ss:$8 sps:$4 sm:$0xff]   ;;  %v3506_v63 = vld [vmem:[%s2977_s24 + $0x140] sm:$0xff] }
  0x9d   : > { %1123 = vmatprep.subr.bf16.mxu0 %v2579_v50  ;;  %v2621_v50 = vld [vmem:[%s3792_s1 + $0x2c4] ss:$8 sps:$4 sm:$0xff]  }
  0xa0   : > { %1124 = vmatpush1.bf16.msra.mxu0 %v2577_v53  ;;  %v2622_v53 = vld [vmem:[%s3792_s1 + $0x2d0] ss:$8 sps:$4 sm:$0xff]  }
  0xa1   : > { %1125 = vmatprep.subr.bf16.mxu0 %v2582_v54  ;;  %v2627_v54 = vld [vmem:[%s3792_s1 + $0x2e4] ss:$8 sps:$4 sm:$0xff]  }
  0xa4   : > { %1126 = vmatpush1.bf16.msra.mxu0 %v2580_v57  ;;  %v2628_v57 = vld [vmem:[%s3792_s1 + $0x2f0] ss:$8 sps:$4 sm:$0xff]  }
  0xa5   : > { %1168 = vmatprep.subr.bf16.mxu0 %v2585_v14  ;;  %v3458_v14 = vld [vmem:[%s2977_s24 + $0x20] sm:$0xff] }
  0xa7   : > { %1128 = vmatmul.mubr.bf16.vlgmr.msra.gmra.mrb[0].mxu0 %v422_v0  ;;  %v3464_v0 = vld [vmem:[%s2977_s24 + $0x88] sm:$0xff] }
  0xa8   : > { %1169 = vmatpush1.bf16.msra.mxu0 %v2583_v2  ;;  %1137 = vmatprep.mubr.bf16.mxu0 %v429_v5  ;;  %v424_v2 = vpack.c.bf16 %v3461_v17, %v3458_v14  ;;  %v431_v5 = vpack.c.bf16 %v3467_v1, %v3464_v0 }
  0xa9   : > { %1170 = vmatprep.subr.bf16.mxu0 %v2588_v6  ;;  %v3474_v6 = vld [vmem:[%s2977_s24 + $0x80] sm:$0xff] }
  0xac   : > { %1171 = vmatpush1.bf16.msra.mxu0 %v2586_v58  ;;  %v3483_v58 = vld [vmem:[%s2977_s24 + $0x118] sm:$0xff] }
  0xad   : > { %1172 = vmatprep.subr.bf16.mxu0 %v2591_v59  ;;  %v430_v59 = vpack.c.bf16 %v3477_v27, %v3474_v6  ;;  %v437_v7 = vpack.c.bf16 %v3483_v58, %v3480_v29 }
  0xaf   : > { %1138 = vmatmul.mubr.bf16.gmra.mrb[4].mxu0 %v428_v15  ;;  %v3490_v15 = vld [vmem:[%s2977_s24 + $0xe0] sm:$0xff] }
  0xb0   : > { %1173 = vmatpush1.bf16.msra.mxu0 %v2589_v18  ;;  %1147 = vmatprep.mubr.bf16.mxu0 %v435_v22  ;;  %v3496_v18 = vld [vmem:[%s2977_s24 + $0x148] sm:$0xff]  ;;  %v3499_v22 = vld [vmem:[%s2977_s24 + $0x178] sm:$0xff] }
  0xb1   : > { %1174 = vmatprep.subr.bf16.mxu0 %v2594_v25  ;;  %v436_v25 = vpack.c.bf16 %v3493_v16, %v3490_v15  ;;  %v443_v62 = vpack.c.bf16 %v3499_v22, %v3496_v18 }
  0xb4   : > { %1175 = vmatpush1.bf16.msra.mxu0 %v2592_v8  ;;  %v3509_v8 = vld [vmem:[%s2977_s24 + $0x170] sm:$0xff] }
  0xb5   : > { %1176 = vmatprep.subr.bf16.mxu0 %v2597_v9  ;;  %v442_v9 = vpack.c.bf16 %v3509_v8, %v3506_v63 }
  0xb7   : > { %1148 = vmatmul.mubr.bf16.gmra.mrb[8].mxu0 %v434_v28  ;;  %v2672_v28 = vld [vmem:[%s3793_s2 + $0xd0] ss:$8 sps:$4 sm:$0xff]  }
  0xb8   : > { %1177 = vmatpush1.bf16.msra.mxu0 %v2595_v32  ;;  %1157 = vmatprep.mubr.bf16.mxu0 %v441_v33  ;;  %v2673_v32 = vld [vmem:[%s3793_s2 + $0xe4] ss:$8 sps:$4 sm:$0xff]   ;;  %v2675_v33 = vld [vmem:[%s3793_s2 + $0xe0] ss:$8 sps:$4 sm:$0xff]  }
  0xb9   : > { %1178 = vmatprep.subr.bf16.mxu0 %v2600_v42  ;;  %1486 = vmatpush1.bf16.msra.mxu1 %v2672_v28  ;;  %v2676_v42 = vld [vmem:[%s3793_s2 + $0xf4] ss:$8 sps:$4 sm:$0xff]   ;;  %v2687_v28 = vld [vmem:[%s3794_s3 + $0x24] ss:$8 sps:$4 sm:$0xff]  }
  0xba   : > { %1487 = vmatprep.subr.bf16.mxu1 %v2673_v32 }
  0xbc   : > { %1179 = vmatpush1.bf16.msra.mxu0 %v2598_v12  ;;  %v2678_v12 = vld [vmem:[%s3793_s2 + $0xf0] ss:$8 sps:$4 sm:$0xff]  }
  0xbd   : > { %1180 = vmatprep.subr.bf16.mxu0 %v2603_v13  ;;  %1488 = vmatpush1.bf16.msra.mxu1 %v2675_v33  ;;  %v2681_v13 = vld [vmem:[%s3794_s3 + $0x4] ss:$8 sps:$4 sm:$0xff]  }
  0xbe   : > { %1489 = vmatprep.subr.bf16.mxu1 %v2676_v42 }
  0xbf   : > { %1158 = vmatmul.mubr.bf16.gmra.mrb[12].mxu0 %v440_v34  ;;  %v3531_v34 = vstv %s540_s19  ;;  %s315_s19 = scalar_lea.vmem [#allocation5], %s2178_s10 }
  0xc0   : > { %1181 = vmatpush1.bf16.msra.mxu0 %v2601_v35  ;;  %1200 = vmatprep.mubr.bf16.mxu0 %v425_v43  ;;  %s2101_s20 = sshll.u32 %s315_s19, 4  ;;  %s3751_s20 = int_to_ptr.vmem [resolvable:$true] %s2101_s20 }
  0xc1   : > { %1182 = vmatprep.subr.bf16.mxu0 %v2606_v44  ;;  %1490 = vmatpush1.bf16.msra.mxu1 %v2678_v12  ;;  %s2758_s25 = scalar_lea.vmem %s3751_s20, 128 }
  0xc2   : > { %1750 = vmatprep.subr.bf16.mxu1 %v2681_v13  ;;  %p2759_p10 = scmp.ne.s32.totalorder %s3751_s20, %s2758_s25 }
  0xc4   : > { %1183 = vmatpush1.bf16.msra.mxu0 %v2604_v45  ;;  %p2760_p11 = pnand %p2759_p10, %p2912_p5 }
  0xc5   : > { %1184 = vmatprep.subr.bf16.mxu0 %v2609_v38 }
  0xc6   : > { %p2761_p12 = pneg %p2760_p11 }
  0xc8   : > { %1185 = vmatpush1.bf16.msra.mxu0 %v2607_v19 }
  0xc9   : > { %1186 = vmatprep.subr.bf16.mxu0 %v2612_v23 }
  0xcc   : > { %1187 = vmatpush1.bf16.msra.mxu0 %v2610_v39 }
  0xcd   : > { %1188 = vmatprep.subr.bf16.mxu0 %v2615_v46 }
  0xd0   : > { %1189 = vmatpush1.bf16.msra.mxu0 %v2613_v47 }
  0xd1   : > { %1190 = vmatprep.subr.bf16.mxu0 %v2618_v48 }
  0xd4   : > { %1191 = vmatpush1.bf16.msra.mxu0 %v2616_v49 }
  0xd5   : > { %1192 = vmatprep.subr.bf16.mxu0 %v2621_v50 }
  0xd8   : > { %1193 = vmatpush1.bf16.msra.mxu0 %v2619_v51 }
  0xd9   : > { %1194 = vmatprep.subr.bf16.mxu0 %v2624_v52 }
  0xdc   : > { %1195 = vmatpush1.bf16.msra.mxu0 %v2622_v53  ;;  %v2679_v53 = vld [vmem:[%s3794_s3] ss:$8 sps:$4 sm:$0xff]  }
  0xdd   : > { %1196 = vmatprep.subr.bf16.mxu0 %v2627_v54 }
  0xe0   : > { %1197 = vmatpush1.bf16.msra.mxu0 %v2625_v55 }
  0xe1   : > { %1198 = vmatprep.subr.bf16.mxu0 %v2630_v56  ;;  %v2684_v56 = vld [vmem:[%s3794_s3 + $0x14] ss:$8 sps:$4 sm:$0xff]  }
  0xe4   : > { %1199 = vmatpush1.bf16.msra.mxu0 %v2628_v57 }
  0xe7   : > { %1201 = vmatmul.mubr.bf16.vlgmr.msra.gmra.mrb[0].mxu0 %v424_v2 }
  0xe8   : > { %1210 = vmatprep.mubr.bf16.mxu0 %v431_v5 }
  0xef   : > { %1211 = vmatmul.mubr.bf16.gmra.mrb[4].mxu0 %v430_v59 }
  0xf0   : > { %1220 = vmatprep.mubr.bf16.mxu0 %v437_v7 }
  0xf7   : > { %1221 = vmatmul.mubr.bf16.gmra.mrb[8].mxu0 %v436_v25  ;;  %v2682_v25 = vld [vmem:[%s3794_s3 + $0x10] ss:$8 sps:$4 sm:$0xff]  }
  0xf8   : > { %1230 = vmatprep.mubr.bf16.mxu0 %v443_v62 }
  0xff   : > { %1231 = vmatmul.mubr.bf16.gmra.mrb[12].mxu0 %v442_v9 }
 0x1ba   : > { %v1202_v35 = vpop.f32.mrb[0].mxu0 }
 0x1bb   : > { %v2387_v43 = vadd.f32 %v1202_v35, %v3531_v34  ;;  %v1204_v44 = vpop.f32.mrb[1].mxu0  ;;  %v2685_v35 = vld [vmem:[%s3794_s3 + $0x20] ss:$8 sps:$4 sm:$0xff]  }
 0x1bc   : > { %v2388_v45 = vadd.f32 %v1204_v44, %v3531_v34  ;;  %v1206_v38 = vpop.f32.mrb[2].mxu0 }
 0x1bd   : > { %v2389_v19 = vadd.f32 %v1206_v38, %v3531_v34  ;;  %v1208_v23 = vpop.f32.mrb[3].mxu0  ;;  %v1241_v46 = vmax.f32 %v2387_v43, 0.0 }
 0x1be   : > { %v2390_v39 = vadd.f32 %v1208_v23, %v3531_v34  ;;  %v1242_v48 = vmax.f32 %v2388_v45, 0.0  ;;  %v2690_v45 = vld [vmem:[%s3794_s3 + $0x34] ss:$8 sps:$4 sm:$0xff]  }
 0x1bf   : > { %v1243_v47 = vmax.f32 %v2389_v19, 0.0 }
 0x1c0   : > { %v1244_v49 = vmax.f32 %v2390_v39, 0.0 }
 0x1c1   : > { %v1257_v50 = vpack.c.bf16 %v1243_v47, %v1241_v46  ;;  %v2688_v47 = vld [vmem:[%s3794_s3 + $0x30] ss:$8 sps:$4 sm:$0xff]  }
 0x1c2   : > { %v1212_v51 = vpop.f32.mrb[4].mxu0  ;;  %v1258_v52 = vpack.c.bf16 %v1244_v49, %v1242_v48 }
 0x1c3   : > { %v2391_v54 = vadd.f32 %v1212_v51, %v3531_v34  ;;  %v1214_v55 = vpop.f32.mrb[5].mxu0 }
 0x1c4   : > { %v2392_v57 = vadd.f32 %v1214_v55, %v3531_v34  ;;  %v1216_v2 = vpop.f32.mrb[6].mxu0  ;;  %1491 = vmatprep.mubr.bf16.mxu1 %v1258_v52 }
 0x1c5   : > { %v2393_v5 = vadd.f32 %v1216_v2, %v3531_v34  ;;  %v1218_v59 = vpop.f32.mrb[7].mxu0  ;;  %1492 = vmatmul.mubr.bf16.vlgmr.msra.gmra.mrb[0].mxu1 %v1257_v50  ;;  %v1245_v62 = vmax.f32 %v2391_v54, 0.0  ;;  %v2693_v50 = vld [vmem:[%s3794_s3 + $0x44] ss:$8 sps:$4 sm:$0xff]  }
 0x1c6   : > { %v2394_v7 = vadd.f32 %v1218_v59, %v3531_v34  ;;  %1751 = vmatpush1.bf16.msra.mxu1 %v2679_v53  ;;  %v1246_v32 = vmax.f32 %v2392_v57, 0.0 }
 0x1c7   : > { %v1247_v9 = vmax.f32 %v2393_v5, 0.0  ;;  %1752 = vmatprep.subr.bf16.mxu1 %v2684_v56  ;;  %v2691_v56 = vld [vmem:[%s3794_s3 + $0x40] ss:$8 sps:$4 sm:$0xff]   ;;  %v2696_v5 = vld [vmem:[%s3794_s3 + $0x54] ss:$8 sps:$4 sm:$0xff]  }
 0x1c8   : > { %v1248_v33 = vmax.f32 %v2394_v7, 0.0 }
 0x1c9   : > { %v1259_v42 = vpack.c.bf16 %v1247_v9, %v1245_v62 }
 0x1ca   : > { %v1260_v12 = vpack.c.bf16 %v1248_v33, %v1246_v32  ;;  %v1222_v13 = vpop.f32.mrb[8].mxu0  ;;  %1753 = vmatpush1.bf16.msra.mxu1 %v2682_v25 }
 0x1cb   : > { %v2395_v43 = vadd.f32 %v1222_v13, %v3531_v34  ;;  %v1224_v44 = vpop.f32.mrb[9].mxu0  ;;  %1754 = vmatprep.subr.bf16.mxu1 %v2687_v28  ;;  %v2694_v28 = vld [vmem:[%s3794_s3 + $0x50] ss:$8 sps:$4 sm:$0xff]  }
 0x1cc   : > { %v2396_v38 = vadd.f32 %v1224_v44, %v3531_v34  ;;  %v1226_v19 = vpop.f32.mrb[10].mxu0  ;;  %1501 = vmatprep.mubr.bf16.mxu1 %v1260_v12  ;;  %v2702_v44 = vld [vmem:[%s3794_s3 + $0x74] ss:$8 sps:$4 sm:$0xff]  }
 0x1cd   : > { %v2397_v23 = vadd.f32 %v1226_v19, %v3531_v34  ;;  %v1228_v39 = vpop.f32.mrb[11].mxu0  ;;  %1502 = vmatmul.mubr.bf16.gmra.mrb[4].mxu1 %v1259_v42  ;;  %v1249_v48 = vmax.f32 %v2395_v43, 0.0  ;;  %v2699_v42 = vld [vmem:[%s3794_s3 + $0x64] ss:$8 sps:$4 sm:$0xff]   ;;  %v2703_v19 = vld [vmem:[%s3794_s3 + $0x80] ss:$8 sps:$4 sm:$0xff]  }
 0x1ce   : > { %v2398_v46 = vadd.f32 %v1228_v39, %v3531_v34  ;;  %1755 = vmatpush1.bf16.msra.mxu1 %v2685_v35  ;;  %v1250_v51 = vmax.f32 %v2396_v38, 0.0  ;;  %v2705_v38 = vld [vmem:[%s3794_s3 + $0x84] ss:$8 sps:$4 sm:$0xff]   ;;  %v2706_v39 = vld [vmem:[%s3794_s3 + $0x90] ss:$8 sps:$4 sm:$0xff]  }
 0x1cf   : > { %v1251_v49 = vmax.f32 %v2397_v23, 0.0  ;;  %1756 = vmatprep.subr.bf16.mxu1 %v2690_v45  ;;  %v2700_v45 = vld [vmem:[%s3794_s3 + $0x70] ss:$8 sps:$4 sm:$0xff]   ;;  %v2708_v23 = vld [vmem:[%s3794_s3 + $0x94] ss:$8 sps:$4 sm:$0xff]  }
 0x1d0   : > { %v1252_v52 = vmax.f32 %v2398_v46, 0.0  ;;  %v2711_v46 = vld [vmem:[%s3794_s3 + $0xa4] ss:$8 sps:$4 sm:$0xff]  }
 0x1d1   : > { %v1261_v53 = vpack.c.bf16 %v1251_v49, %v1249_v48  ;;  %v2714_v48 = vld [vmem:[%s3794_s3 + $0xb4] ss:$8 sps:$4 sm:$0xff]   ;;  %v2712_v49 = vld [vmem:[%s3794_s3 + $0xb0] ss:$8 sps:$4 sm:$0xff]  }
 0x1d2   : > { %v1262_v54 = vpack.c.bf16 %v1252_v52, %v1250_v51  ;;  %v1232_v55 = vpop.f32.mrb[12].mxu0  ;;  %1757 = vmatpush1.bf16.msra.mxu1 %v2688_v47  ;;  %v2709_v47 = vld [vmem:[%s3794_s3 + $0xa0] ss:$8 sps:$4 sm:$0xff]   ;;  %v2720_v52 = vld [vmem:[%s3794_s3 + $0xd4] ss:$8 sps:$4 sm:$0xff]  }
 0x1d3   : > { %v2399_v57 = vadd.f32 %v1232_v55, %v3531_v34  ;;  %v1234_v2 = vpop.f32.mrb[13].mxu0  ;;  %1758 = vmatprep.subr.bf16.mxu1 %v2693_v50  ;;  %v2717_v50 = vld [vmem:[%s3794_s3 + $0xc4] ss:$8 sps:$4 sm:$0xff]   ;;  %v2715_v51 = vld [vmem:[%s3794_s3 + $0xc0] ss:$8 sps:$4 sm:$0xff]  }
 0x1d4   : > { %v2400_v59 = vadd.f32 %v1234_v2, %v3531_v34  ;;  %v1236_v7 = vpop.f32.mrb[14].mxu0  ;;  %1511 = vmatprep.mubr.bf16.mxu1 %v1262_v54  ;;  %v2723_v54 = vld [vmem:[%s3794_s3 + $0xe4] ss:$8 sps:$4 sm:$0xff]   ;;  %v2721_v55 = vld [vmem:[%s3794_s3 + $0xe0] ss:$8 sps:$4 sm:$0xff]   ;;  %v1298_v2 = vstv %s2277_s13 }
 0x1d5   : > { %v2401_v25 = vadd.f32 %v1236_v7, %v3531_v34  ;;  %v1238_v62 = vpop.f32.mrb[15].mxu0  ;;  %1512 = vmatmul.mubr.bf16.gmra.mrb[8].mxu1 %v1261_v53  ;;  %v1253_v32 = vmax.f32 %v2399_v57, 0.0  ;;  %v2718_v53 = vld [vmem:[%s3794_s3 + $0xd0] ss:$8 sps:$4 sm:$0xff]  }
 0x1d6   : > { %v2402_v9 = vadd.f32 %v1238_v62, %v3531_v34  ;;  %1759 = vmatpush1.bf16.msra.mxu1 %v2691_v56  ;;  %v1254_v12 = vmax.f32 %v2400_v59, 0.0  ;;  %v2697_v34 = vld [vmem:[%s3794_s3 + $0x60] ss:$8 sps:$4 sm:$0xff]   ;;  %v2726_v56 = vld [vmem:[%s3794_s3 + $0xf4] ss:$8 sps:$4 sm:$0xff]  }
 0x1d7   : > { %v1255_v33 = vmax.f32 %v2401_v25, 0.0  ;;  %1760 = vmatprep.subr.bf16.mxu1 %v2696_v5  ;;  %v2724_v57 = vld [vmem:[%s3794_s3 + $0xf0] ss:$8 sps:$4 sm:$0xff]  }
 0x1d8   : > { %v1256_v13 = vmax.f32 %v2402_v9, 0.0 }
 0x1d9   : > { %v1263_v35 = vpack.c.bf16 %v1255_v33, %v1253_v32 }
 0x1da   : > { %v1264_v43 = vpack.c.bf16 %v1256_v13, %v1254_v12  ;;  %1761 = vmatpush1.bf16.msra.mxu1 %v2694_v28 }
 0x1db   : > { %1762 = vmatprep.subr.bf16.mxu1 %v2699_v42 }
 0x1dc   : > { %1521 = vmatprep.mubr.bf16.mxu1 %v1264_v43 }
 0x1dd   : > { %1522 = vmatmul.mubr.bf16.gmra.mrb[12].mxu1 %v1263_v35 }
 0x1de   : > { %1763 = vmatpush1.bf16.msra.mxu1 %v2697_v34 }
 0x1df   : > { %1764 = vmatprep.subr.bf16.mxu1 %v2702_v44 }
 0x1e2   : > { %1765 = vmatpush1.bf16.msra.mxu1 %v2700_v45 }
 0x1e3   : > { %1766 = vmatprep.subr.bf16.mxu1 %v2705_v38 }
 0x1e6   : > { %1767 = vmatpush1.bf16.msra.mxu1 %v2703_v19 }
 0x1e7   : > { %1768 = vmatprep.subr.bf16.mxu1 %v2708_v23 }
 0x1ea   : > { %1769 = vmatpush1.bf16.msra.mxu1 %v2706_v39 }
 0x1eb   : > { %1770 = vmatprep.subr.bf16.mxu1 %v2711_v46 }
 0x1ee   : > { %1771 = vmatpush1.bf16.msra.mxu1 %v2709_v47 }
 0x1ef   : > { %1772 = vmatprep.subr.bf16.mxu1 %v2714_v48 }
 0x1f2   : > { %1773 = vmatpush1.bf16.msra.mxu1 %v2712_v49 }
 0x1f3   : > { %1774 = vmatprep.subr.bf16.mxu1 %v2717_v50 }
 0x1f6   : > { %1775 = vmatpush1.bf16.msra.mxu1 %v2715_v51 }
 0x1f7   : > { %1776 = vmatprep.subr.bf16.mxu1 %v2720_v52 }
 0x1fa   : > { %1777 = vmatpush1.bf16.msra.mxu1 %v2718_v53 }
 0x1fb   : > { %1778 = vmatprep.subr.bf16.mxu1 %v2723_v54 }
 0x1fe   : > { %1779 = vmatpush1.bf16.msra.mxu1 %v2721_v55 }
 0x1ff   : > { %1780 = vmatprep.subr.bf16.mxu1 %v2726_v56 }
 0x202   : > { %1781 = vmatpush1.bf16.msra.mxu1 %v2724_v57 }
 0x298   : > { %v1493_v5 = vpop.f32.mrb[0].mxu1 }
 0x299   : > { %v1494_v59 = vadd.f32 %v1493_v5, %v1298_v2  ;;  %v1495_v7 = vpop.f32.mrb[1].mxu1 }
 0x29a   : > { %v1496_v25 = vadd.f32 %v1495_v7, %v1298_v2  ;;  %v1497_v62 = vpop.f32.mrb[2].mxu1 }
 0x29b   : > { %v1498_v9 = vadd.f32 %v1497_v62, %v1298_v2  ;;  %v1499_v28 = vpop.f32.mrb[3].mxu1  ;;  %v1532_v33 = vmax.f32 %v1494_v59, 0.0 }
 0x29c   : > { %v1500_v32 = vadd.f32 %v1499_v28, %v1298_v2  ;;  %v1533_v12 = vmax.f32 %v1496_v25, 0.0 }
 0x29d   : > { %v1534_v42 = vmax.f32 %v1498_v9, 0.0 }
 0x29e   : > { %v1535_v13 = vmax.f32 %v1500_v32, 0.0 }
 0x29f   : > { %v1548_v35 = vpack.c.bf16 %v1534_v42, %v1532_v33 }
 0x2a0   : > { %v1549_v43 = vpack.c.bf16 %v1535_v13, %v1533_v12  ;;  %v1503_v34 = vpop.f32.mrb[4].mxu1 }
 0x2a1   : > { %v1504_v44 = vadd.f32 %v1503_v34, %v1298_v2  ;;  %v1505_v45 = vpop.f32.mrb[5].mxu1 }
 0x2a2   : > { %v1506_v38 = vadd.f32 %v1505_v45, %v1298_v2  ;;  %v1507_v19 = vpop.f32.mrb[6].mxu1  ;;  %1782 = vmatprep.mubr.bf16.mxu1 %v1549_v43 }
 0x2a3   : > { %v1508_v23 = vadd.f32 %v1507_v19, %v1298_v2  ;;  %v1509_v39 = vpop.f32.mrb[7].mxu1  ;;  %1783 = vmatmul.mubr.bf16.vlgmr.msra.gmra.mrb[16].mxu1 %v1548_v35  ;;  %v1536_v47 = vmax.f32 %v1504_v44, 0.0 }
 0x2a4   : > { %v1510_v46 = vadd.f32 %v1509_v39, %v1298_v2  ;;  %v1537_v49 = vmax.f32 %v1506_v38, 0.0 }
 0x2a5   : > { %v1538_v48 = vmax.f32 %v1508_v23, 0.0 }
 0x2a6   : > { %v1539_v50 = vmax.f32 %v1510_v46, 0.0 }
 0x2a7   : > { %v1550_v51 = vpack.c.bf16 %v1538_v48, %v1536_v47  ;;  %v2827_v48 = vmov 0  }
 0x2a8   : > { %v1551_v52 = vpack.c.bf16 %v1539_v50, %v1537_v49  ;;  %v1513_v53 = vpop.f32.mrb[8].mxu1  ;;  %v388_v49 = vadd.f32 %v3025_v30, %v3458_v14  ;;  %v390_v50 = vadd.f32 %v3028_v31, %v3461_v17  ;;  %v392_v31 = vadd.f32 %v3119_v3, %v3474_v6 }
 0x2a9   : > { %v1514_v54 = vadd.f32 %v1513_v53, %v1298_v2  ;;  %v1515_v55 = vpop.f32.mrb[9].mxu1  ;;  %v405_v53 = vmul.f32 0.33333334, %v3008_v24  ;;  %v393_v24 = vadd.f32 %v3102_v60, %v3464_v0 }
 0x2aa   : > { %v1516_v56 = vadd.f32 %v1515_v55, %v1298_v2  ;;  %v1517_v57 = vpop.f32.mrb[10].mxu1  ;;  %1792 = vmatprep.mubr.bf16.mxu1 %v1551_v52 }
 0x2ab   : > { %v1518_v5 = vadd.f32 %v1517_v57, %v1298_v2  ;;  %v1519_v59 = vpop.f32.mrb[11].mxu1  ;;  %1793 = vmatmul.mubr.bf16.gmra.mrb[20].mxu1 %v1550_v51  ;;  %v1540_v25 = vmax.f32 %v1514_v54, 0.0  ;;  %v3646_v51 = vstv %s2310_s17  ;;  %v409_v6 = vmul.f32 0.33333334, %v393_v24  ;;  %s2362_s17 = sshll.u32 %s2895_s9, 7  ;;  %s2828_s9 = smov [#allocation5]  }
 0x2ac   : > { %v1520_v7 = vadd.f32 %v1519_v59, %v1298_v2  ;;  %v1541_v9 = vmax.f32 %v1516_v56, 0.0  ;;  %v406_v56 = vmul.f32 0.33333334, %v390_v50  ;;  %v407_v59 = vmul.f32 0.33333334, %v3014_v26  ;;  %s3749_s23 = scalar_lea.hbm %s3799_s8, %s2362_s17  ;;  %s2762_s24 = sshll.u32 %s2828_s9, 4  ;;  %s2763_s24 = int_to_ptr.vmem [resolvable:$false] %s2762_s24 }
 0x2ad   : > { %v1542_v62 = vmax.f32 %v1518_v5, 0.0  ;;  %v395_v26 = vadd.f32 %v3105_v61, %v3467_v1  ;;  %s2764_s10 = scalar_lea.vmem %s2763_s24, 256  ;;  %p2765_p13 = scmp.lt.s32.totalorder %s3751_s20, %s2763_s24 }
 0x2ae   : > { %v1543_v28 = vmax.f32 %v1520_v7, 0.0  ;;  %p2766_p0 = scmp.lt.s32.totalorder %s2764_s10, %s2758_s25 }
 0x2af   : > { %v1552_v32 = vpack.c.bf16 %v1542_v62, %v1540_v25 }
 0x2b0   : > { %v1553_v33 = vpack.c.bf16 %v1543_v28, %v1541_v9  ;;  %v1523_v42 = vpop.f32.mrb[12].mxu1  ;;  %v394_v9 = vadd.f32 %v3122_v4, %v3477_v27  ;;  %v411_v4 = vmul.f32 0.33333334, %v395_v26  ;;  %p2767_p1 = por %p2766_p0, %p2765_p13 }
 0x2b1   : > { %v1524_v12 = vadd.f32 %v1523_v42, %v1298_v2  ;;  %v1525_v13 = vpop.f32.mrb[13].mxu1  ;;  %v408_v42 = vmul.f32 0.33333334, %v392_v31  ;;  %v401_v31 = vadd.f32 %v3170_v36, %v3496_v18 }
 0x2b2   : > { %v1526_v35 = vadd.f32 %v1525_v13, %v1298_v2  ;;  %v1527_v43 = vpop.f32.mrb[14].mxu1  ;;  %1802 = vmatprep.mubr.bf16.mxu1 %v1553_v33  ;;  %v410_v60 = vmul.f32 0.33333334, %v394_v9  ;;  %p2768_p2 = pnand %p2767_p1, %p2761_p12 }
 0x2b3   : > { %v1528_v34 = vadd.f32 %v1527_v43, %v1298_v2  ;;  %v1529_v44 = vpop.f32.mrb[15].mxu1  ;;  %1803 = vmatmul.mubr.bf16.gmra.mrb[24].mxu1 %v1552_v32  ;;  %v1544_v38 = vmax.f32 %v1524_v12, 0.0 }
 0x2b4   : > { %v1530_v45 = vadd.f32 %v1529_v44, %v1298_v2  ;;  %v1545_v23 = vmax.f32 %v1526_v35, 0.0  ;;  %v404_v2 = vmul.f32 0.33333334, %v388_v49  ;;  %v399_v49 = vadd.f32 %v3139_v11, %v3483_v58 }
 0x2b5   : > { %v1546_v19 = vmax.f32 %v1528_v34, 0.0 }
 0x2b6   : > { %v1547_v39 = vmax.f32 %v1530_v45, 0.0 }
 0x2b7   : > { %v1554_v46 = vpack.c.bf16 %v1546_v19, %v1544_v38  ;;  %v396_v38 = vadd.f32 %v3153_v20, %v3490_v15 }
 0x2b8   : > { %v1555_v47 = vpack.c.bf16 %v1547_v39, %v1545_v23  ;;  %v397_v39 = vadd.f32 %v3136_v10, %v3480_v29 }
 0x2ba   : > { %1812 = vmatprep.mubr.bf16.mxu1 %v1555_v47  ;;  %v398_v47 = vadd.f32 %v3156_v21, %v3493_v16  ;;  %v415_v21 = vmul.f32 0.33333334, %v399_v49  ;;  %v2735_v49 = vld [vmem:[%s3797_s6 + $0x60] sm:$0xff]  }
 0x2bb   : > { %1813 = vmatmul.mubr.bf16.gmra.mrb[28].mxu1 %v1554_v46 }
 0x2bc   : > { %1900 = vmatprep.mubr.bf16.mxu1 %v2827_v48  ;;  %v414_v29 = vmul.f32 0.33333334, %v398_v47  ;;  %v2733_v47 = vld [vmem:[%s3797_s6 + $0x58] sm:$0xff]  }
 0x376   : > { %v1784_v52 = vpop.f32.mrb[16].mxu1 }
 0x377   : > { %v1785_v54 = vadd.f32 %v1784_v52, %v3646_v51  ;;  %v1786_v55 = vpop.f32.mrb[17].mxu1  ;;  %v412_v52 = vmul.f32 0.33333334, %v396_v38  ;;  %v2728_v38 = vld [vmem:[%s3797_s6] sm:$0xff]  }
 0x378   : > { %v1787_v57 = vadd.f32 %v1786_v55, %v3646_v51  ;;  %v1788_v5 = vpop.f32.mrb[18].mxu1 }
 0x379   : > { %v1823_v7 = vadd.f32 %v1785_v54, %v404_v2  ;;  %v1789_v30 = vadd.f32 %v1788_v5, %v3646_v51  ;;  %v1790_v14 = vpop.f32.mrb[19].mxu1  ;;  %v413_v54 = vmul.f32 0.33333334, %v397_v39  ;;  %v2731_v39 = vld [vmem:[%s3797_s6 + $0x50] sm:$0xff]  }
 0x37a   : > { %v1824_v17 = vadd.f32 %v1787_v57, %v405_v53  ;;  %v1791_v25 = vadd.f32 %v1790_v14, %v3646_v51 }
 0x37b   : > { %v1825_v62 = vadd.f32 %v1789_v30, %v406_v56  ;;  %v1839_v32 = vmax.f32 %v1823_v7, 0.0  ;;  %v400_v7 = vadd.f32 %v3182_v40, %v3506_v63 }
 0x37c   : > { %v1826_v28 = vadd.f32 %v1791_v25, %v407_v59  ;;  %v1840_v12 = vmax.f32 %v1824_v17, 0.0  ;;  %v402_v25 = vadd.f32 %v3185_v41, %v3509_v8 }
 0x37d   : > { %v1841_v33 = vmax.f32 %v1825_v62, 0.0  ;;  %v403_v62 = vadd.f32 %v3173_v37, %v3499_v22  ;;  %v416_v26 = vmul.f32 0.33333334, %v400_v7 }
 0x37e   : > { %v1842_v13 = vmax.f32 %v1826_v28, 0.0  ;;  %v1794_v3 = vpop.f32.mrb[20].mxu1  ;;  %v418_v18 = vmul.f32 0.33333334, %v402_v25 }
 0x37f   : > { %v1856_v35 = vpack.c.bf16 %v1841_v33, %v1839_v32  ;;  %v1795_v43 = vadd.f32 %v1794_v3, %v3646_v51  ;;  %v1796_v34 = vpop.f32.mrb[21].mxu1  ;;  %v417_v33 = vmul.f32 0.33333334, %v401_v31  ;;  %v419_v41 = vmul.f32 0.33333334, %v403_v62 }
 0x380   : > { %v1797_v0 = vadd.f32 %v1796_v34, %v3646_v51  ;;  %v1798_v44 = vpop.f32.mrb[22].mxu1  ;;  %v1857_v27 = vpack.c.bf16 %v1842_v13, %v1840_v12 }
 0x381   : > { %v1827_v45 = vadd.f32 %v1795_v43, %v408_v42  ;;  %v1799_v61 = vadd.f32 %v1798_v44, %v3646_v51  ;;  %v1800_v1 = vpop.f32.mrb[23].mxu1 }
 0x382   : > { %v1828_v19 = vadd.f32 %v1797_v0, %v409_v6  ;;  %v1801_v23 = vadd.f32 %v1800_v1, %v3646_v51  ;;  %1868 = vmatprep.subr.bf16.mxu1 %v1857_v27  ;;  %v2727_v1 = vld [vmem:[%s3797_s6 + $0x40] sm:$0xff]  }
 0x383   : > { %v1829_v46 = vadd.f32 %v1799_v61, %v410_v60  ;;  %1869 = vmatpush1.bf16.msra.mxu1 %v1856_v35  ;;  %v1843_v50 = vmax.f32 %v1827_v45, 0.0 }
 0x384   : > { %v1830_v48 = vadd.f32 %v1801_v23, %v411_v4  ;;  %v1844_v20 = vmax.f32 %v1828_v19, 0.0  ;;  %v2729_v19 = vld [vmem:[%s3797_s6 + $0x48] sm:$0xff]  }
 0x385   : > { %v1845_v2 = vmax.f32 %v1829_v46, 0.0  ;;  %v2730_v23 = vld [vmem:[%s3797_s6 + $0x8] sm:$0xff]   ;;  %v2732_v46 = vld [vmem:[%s3797_s6 + $0x10] sm:$0xff]  }
 0x386   : > { %v1846_v15 = vmax.f32 %v1830_v48, 0.0  ;;  %v1804_v53 = vpop.f32.mrb[24].mxu1  ;;  %v2734_v48 = vld [vmem:[%s3797_s6 + $0x18] sm:$0xff]  }
 0x387   : > { %v1858_v55 = vpack.c.bf16 %v1845_v2, %v1843_v50  ;;  %v1805_v56 = vadd.f32 %v1804_v53, %v3646_v51  ;;  %v1806_v10 = vpop.f32.mrb[25].mxu1  ;;  %v2736_v50 = vld [vmem:[%s3797_s6 + $0x20] sm:$0xff]   ;;  %v2737_v2 = vld [vmem:[%s3797_s6 + $0x68] sm:$0xff]   ;;  %v2741_v53 = vld [vmem:[%s3797_s6 + $0x78] sm:$0xff]  }
 0x388   : > { %v1807_v57 = vadd.f32 %v1806_v10, %v3646_v51  ;;  %v1808_v5 = vpop.f32.mrb[26].mxu1  ;;  %v1859_v16 = vpack.c.bf16 %v1846_v15, %v1844_v20  ;;  %v2739_v20 = vld [vmem:[%s3797_s6 + $0x70] sm:$0xff]  }
 0x389   : > { %v1831_v59 = vadd.f32 %v1805_v56, %v412_v52  ;;  %v1809_v11 = vadd.f32 %v1808_v5, %v3646_v51  ;;  %v1810_v58 = vpop.f32.mrb[27].mxu1  ;;  %v2738_v52 = vld [vmem:[%s3797_s6 + $0x28] sm:$0xff]   ;;  %v2740_v15 = vld [vmem:[%s3797_s6 + $0x30] sm:$0xff]  }
 0x38a   : > { %v1832_v30 = vadd.f32 %v1807_v57, %v413_v54  ;;  %v1811_v14 = vadd.f32 %v1810_v58, %v3646_v51  ;;  %1870 = vmatprep.subr.bf16.mxu1 %v1859_v16  ;;  %v2742_v54 = vld [vmem:[%s3797_s6 + $0x38] sm:$0xff]   ;;  %v2344_v16 = vld [vmem:[%s3798_s7] ss:$0 sm:$0xff] }
 0x38b   : > { %v1833_v17 = vadd.f32 %v1809_v11, %v414_v29  ;;  %1871 = vmatpush1.bf16.msra.mxu1 %v1858_v55  ;;  %v1847_v9 = vmax.f32 %v1831_v59, 0.0 }
 0x38c   : > { %v1834_v24 = vadd.f32 %v1811_v14, %v415_v21  ;;  %v1848_v40 = vmax.f32 %v1832_v30, 0.0 }
 0x38d   : > { %v1849_v28 = vmax.f32 %v1833_v17, 0.0 }
 0x38e   : > { %v1850_v63 = vmax.f32 %v1834_v24, 0.0  ;;  %v1814_v32 = vpop.f32.mrb[28].mxu1 }
 0x38f   : > { %v1860_v42 = vpack.c.bf16 %v1849_v28, %v1847_v9  ;;  %v1815_v12 = vadd.f32 %v1814_v32, %v3646_v51  ;;  %v1816_v36 = vpop.f32.mrb[29].mxu1 }
 0x390   : > { %v1817_v13 = vadd.f32 %v1816_v36, %v3646_v51  ;;  %v1818_v3 = vpop.f32.mrb[30].mxu1  ;;  %v1861_v8 = vpack.c.bf16 %v1850_v63, %v1848_v40 }
 0x391   : > { %v1835_v6 = vadd.f32 %v1815_v12, %v416_v26  ;;  %v1819_v37 = vadd.f32 %v1818_v3, %v3646_v51  ;;  %v1820_v22 = vpop.f32.mrb[31].mxu1 }
 0x392   : > { %v1836_v35 = vadd.f32 %v1817_v13, %v417_v33  ;;  %v1821_v43 = vadd.f32 %v1820_v22, %v3646_v51  ;;  %1872 = vmatprep.subr.bf16.mxu1 %v1861_v8  ;;  %v1855_v51 = vld [vmem:[%s3796_s5] sm:$0xf] }
 0x393   : > { %v1837_v34 = vadd.f32 %v1819_v37, %v418_v18  ;;  %1873 = vmatpush1.bf16.msra.mxu1 %v1860_v42  ;;  %v1851_v0 = vmax.f32 %v1835_v6, 0.0 }
 0x394   : > { %v1838_v60 = vadd.f32 %v1821_v43, %v419_v41  ;;  %v1852_v4 = vmax.f32 %v1836_v35, 0.0 }
 0x395   : > { %v1853_v44 = vmax.f32 %v1837_v34, 0.0 }
 0x396   : > { %v1854_v27 = vmax.f32 %v1838_v60, 0.0 }
 0x397   : > { %v1862_v45 = vpack.c.bf16 %v1853_v44, %v1851_v0 }
 0x398   : > { %v1863_v61 = vpack.c.bf16 %v1854_v27, %v1852_v4 }
 0x39a   : > { %1874 = vmatprep.subr.bf16.mxu1 %v1863_v61 }
 0x39b   : > { %1875 = vmatpush1.bf16.msra.mxu1 %v1862_v45 }
 0x39c   : > { %2365 = vmatprep.subr.bf16.mxu1 %v2727_v1 }
 0x39e   : > { %2343 = vmatmul.mubr.msk.bf16.vlgmr.msra.gmra.mrb[32].mxu1 %vm1864_vm0, %v1855_v51 }
 0x39f   : > { %2366 = vmatpush3.bf16.msra.mxu1 %v2728_v38 }
 0x3a0   : > { %2367 = vmatprep.subr.bf16.mxu1 %v2729_v19 }
 0x3a3   : > { %2368 = vmatpush3.bf16.msra.mxu1 %v2730_v23 }
 0x3a4   : > { %2369 = vmatprep.subr.bf16.mxu1 %v2731_v39 }
 0x3a7   : > { %2370 = vmatpush3.bf16.msra.mxu1 %v2732_v46 }
 0x3a8   : > { %2371 = vmatprep.subr.bf16.mxu1 %v2733_v47 }
 0x3ab   : > { %2372 = vmatpush3.bf16.msra.mxu1 %v2734_v48 }
 0x3ac   : > { %2373 = vmatprep.subr.bf16.mxu1 %v2735_v49 }
 0x3af   : > { %2374 = vmatpush3.bf16.msra.mxu1 %v2736_v50 }
 0x3b0   : > { %2375 = vmatprep.subr.bf16.mxu1 %v2737_v2 }
 0x3b3   : > { %2376 = vmatpush3.bf16.msra.mxu1 %v2738_v52 }
 0x3b4   : > { %2377 = vmatprep.subr.bf16.mxu1 %v2739_v20 }
 0x3b7   : > { %2378 = vmatpush3.bf16.msra.mxu1 %v2740_v15 }
 0x3b8   : > { %2379 = vmatprep.subr.bf16.mxu1 %v2741_v53 }
 0x3bb   : > { %2380 = vmatpush3.bf16.msra.mxu1 %v2742_v54 }
 0x471   : > { %v1902_v55 = vpop.f32.mrb[32].mxu1 }
 0x472   : > { %v1904_v56 = vpop.f32.mrb[33].mxu1  ;;  %v1909_v57 = vpack.c.bf16 %v1902_v55, %v1902_v55 }
 0x473   : > { %v1910_v10 = vpack.c.bf16 %v1904_v56, %v1904_v56  ;;  %v1906_v29 = vpop.f32.mrb[34].mxu1 }
 0x474   : > { %v1907_v5 = vpop.f32.mrb[35].mxu1 }
 0x475   : > { %2078 = vmatprep.mubr.bf16.mxu1 %v1910_v10 }
 0x476   : > { %2079 = vmatmul.mubr.bf16.vlgmr.msra.gmra.mrb[36].mxu1 %v1909_v57 }
 0x549   : > { %v2381_v21 = vpop.f32.mrb[36].mxu1 }
 0x54a   : > { %v2382_v59 = vpop.f32.mrb[37].mxu1 }
 0x54b   : > { %v2383_v11 = vadd.f32 %v2382_v59, %v2381_v21  ;;  %v2384_v58 = vpop.f32.mrb[38].mxu1 }
 0x54c   : > { %v2385_v7 = vpop.f32.mrb[39].mxu1 }
 0x54d   : > { %v2081_v30 = vadd.f32 %v2383_v11, %v2344_v16 }
 0x54f   : > { %2086 = vst [vmem:[%s315_s19] sm:$0xff] %v2081_v30 }
 0x550   : > { %2771 = shalt.err (!%p2768_p2)
}
 0x551   : > { %s2772_s26 = scalar_lea.hbm %s3749_s23, 128  ;;  %s2776_s17 = scalar_lea.hbm %s3799_s8, 256 }
 0x552   : > { %p2773_p3 = scmp.ne.s32.totalorder %s3749_s23, %s2772_s26  ;;  %p2777_p8 = scmp.lt.u32.totalorder %s3749_s23, %s3799_s8 }
 0x553   : > { %p2778_p9 = scmp.lt.u32.totalorder %s2776_s17, %s2772_s26  ;;  %p2780_p11 = scmp.lt.u32.totalorder %s2772_s26, %s3749_s23 }
 0x554   : > { %p2774_p4 = pnand %p2773_p3, %p2912_p5 }
 0x555   : > { %p2779_p10 = por %p2778_p9, %p2777_p8 }
 0x556   : > { %p2775_p7 = pneg %p2774_p4 }
 0x557   : > { %p2781_p12 = por %p2780_p11, %p2779_p10 }
 0x559   : > { %p2782_p13 = pnand %p2781_p12, %p2775_p7 }
 0x55b   : > { %2785 = shalt.err (!%p2782_p13)
}
 0x55c   : > { %2440 = dma.vmem_to_hbm [thread:$0]  (%p2912_p5), %s3751_s20, 128, %s3749_s23, %s2088_s18  }
 0x55d PF: > { %p2452_p0 = scmp.ge.s32.totalorder %s2824_s30, 2  ;;  %s2113_s22 = sand.u32 1, %s2812_s27  }
 0x55e   : > { %s2114_s25 = scalar_lea.sflag [#allocation3], %s2113_s22 }
 0x55f   : > { %p2447_p1 = pnand %p2452_p0, %p2916_p6 }
 0x561   : > { %2807 = dma.done.wait (!%p2447_p1), %s2114_s25, 128  }
 0x562   : > { %2809 = vsyncadd (!%p2447_p1), %s2114_s25, 4294967168  ;;  %p19_p2 = scmp.ge.s32.totalorder %s2899_s11, 4   ;;  %s3803_s27 = smov %s2816_s28 }
 0x563   : > { %s3804_s28 = smov %s2820_s29  ;;  %s3805_s29 = smov %s2910_s14 }
 0x564   : > { %s3806_s30 = smov %s2899_s11  ;;  %21 = sbr.rel (!%p19_p2) target bundleno = 4 (0x4), region = 92 }
 0x56b   :  { %2119 = vsyncpa [#allocation3], 1 }
 0x56c   :  { %2121 = vsyncpa [#allocation3 + $0x1], 1 }
 0x56d   :  { %2122 = vsyncpa [#allocation4], 1 }
 0x56e   :  { %2124 = vsyncpa [#allocation4 + $0x1], 1 }

</bundles_post_ra>
